<compile_context>
chip_gen: v7x
topology: tpu7x:2x2x1
jax: 0.10.0
libtpu: 0.0.40
codegen_flags: <defaults>
</compile_context>

<pallas_src>
import jax
import jax.numpy as jnp
from jax import lax
from jax.experimental import pallas as pl
from jax.experimental.pallas import tpu as pltpu

# ---- small, module-consistent shapes -----------------------------------------
H = 32          # h_dim
IN_DIM = 16     # number of entities (in_dim)
NUM_RELS = 8
T = 4           # seq_len (history cap)
NB = 3          # max neighbors per history step
B = 8           # batch (number of triplets)


# --------------------------- fused RENet kernel --------------------------------
def renet_fused_kernel(ent_ref, rel_ref, eid_ref, rid_ref, tgt_ref,
                       hist_ref, nbm_ref, len_ref,
                       wih_ref, whh_ref, bih_ref, bhh_ref,
                       whead_ref, bhead_ref,
                       pred_ref, loss_ref):
    f32 = jnp.float32
    ent = ent_ref[...]                                   # (E, H)  resident in VMEM
    rel = rel_ref[...]                                   # (R, H)

    # ---- embedding gathers via one-hot matmuls (MXU) ---------------------------
    ent_iota = lax.broadcasted_iota(jnp.int32, (B, IN_DIM), 1)
    rel_iota = lax.broadcasted_iota(jnp.int32, (B, NUM_RELS), 1)
    oh_e = jnp.where(ent_iota == eid_ref[...], 1.0, 0.0).astype(f32)   # (B, E)
    oh_r = jnp.where(rel_iota == rid_ref[...], 1.0, 0.0).astype(f32)   # (B, R)
    oh_t = jnp.where(ent_iota == tgt_ref[...], 1.0, 0.0).astype(f32)   # (B, E) CE target
    e_emb = jnp.dot(oh_e, ent, preferred_element_type=f32)             # (B, H)
    r_emb = jnp.dot(oh_r, rel, preferred_element_type=f32)             # (B, H)

    # ---- masked neighbour mean (MeanAggregator, gcn=False) ---------------------
    # hist/nbm rows are t-major:  row = t*B + b
    hist = hist_ref[...]                                 # (T*B, NB) int32
    nbm = nbm_ref[...]                                   # (T*B, NB) f32
    nb_iota = lax.broadcasted_iota(jnp.int32, (T * B, IN_DIM), 1)
    dist = jnp.zeros((T * B, IN_DIM), f32)
    for nb in range(NB):                                 # NB is a compile-time constant
        dist = dist + jnp.where(nb_iota == hist[:, nb:nb + 1],
                                nbm[:, nb:nb + 1], 0.0)
    denom = jnp.maximum(jnp.sum(nbm, axis=1, keepdims=True), 1.0)      # (T*B, 1)
    mean_nb = jnp.dot(dist / denom, ent, preferred_element_type=f32)   # (T*B, H)

    # ---- GRU input projection, split by input chunk -----------------------------
    # x_t = cat(e_emb, mean_nb_t, r_emb); e_emb / r_emb parts are time-invariant, so
    # project them once per gate and only project the neighbour-mean part per step.
    wih_r, wih_z, wih_n = wih_ref[0], wih_ref[1], wih_ref[2]           # (3H, H) each
    const_r = (jnp.dot(e_emb, wih_r[0:H], preferred_element_type=f32)
               + jnp.dot(r_emb, wih_r[2 * H:3 * H], preferred_element_type=f32)
               + bih_ref[0])                                           # (B, H)
    const_z = (jnp.dot(e_emb, wih_z[0:H], preferred_element_type=f32)
               + jnp.dot(r_emb, wih_z[2 * H:3 * H], preferred_element_type=f32)
               + bih_ref[1])
    const_n = (jnp.dot(e_emb, wih_n[0:H], preferred_element_type=f32)
               + jnp.dot(r_emb, wih_n[2 * H:3 * H], preferred_element_type=f32)
               + bih_ref[2])
    nbp_r = jnp.dot(mean_nb, wih_r[H:2 * H], preferred_element_type=f32)   # (T*B, H)
    nbp_z = jnp.dot(mean_nb, wih_z[H:2 * H], preferred_element_type=f32)
    nbp_n = jnp.dot(mean_nb, wih_n[H:2 * H], preferred_element_type=f32)

    # loop-invariant hidden weights / biases loaded once
    whh_r, whh_z, whh_n = whh_ref[0], whh_ref[1], whh_ref[2]           # (H, H) each
    bhh_r, bhh_z, bhh_n = bhh_ref[0], bhh_ref[1], bhh_ref[2]           # (1, H) each
    lens = len_ref[...]                                  # (B, 1) int32, loaded once

    # statically unrolled T=4 recurrence; per-gate weights -> no mid-vreg slicing
    h = jnp.zeros((B, H), f32)
    for t in range(T):
        lo = t * B
        gh_r = jnp.dot(h, whh_r, preferred_element_type=f32) + bhh_r
        gh_z = jnp.dot(h, whh_z, preferred_element_type=f32) + bhh_z
        gh_n = jnp.dot(h, whh_n, preferred_element_type=f32) + bhh_n
        rg = jax.nn.sigmoid(const_r + nbp_r[lo:lo + B] + gh_r)
        zg = jax.nn.sigmoid(const_z + nbp_z[lo:lo + B] + gh_z)
        ng = jnp.tanh(const_n + nbp_n[lo:lo + B] + rg * gh_n)
        h_new = (1.0 - zg) * ng + zg * h
        # prefix-validity masking == PyTorch packed-sequence final hidden
        # (zero-length histories stay at h = 0, matching torch.cat with zeros).
        h = jnp.where(lens > t, h_new, h)

    # ---- prediction head (split matmuls, no concat) + cross entropy ------------
    whead = whead_ref[...]                               # (3H, IN_DIM)
    logits = (jnp.dot(e_emb, whead[0:H], preferred_element_type=f32)
              + jnp.dot(h, whead[H:2 * H], preferred_element_type=f32)
              + jnp.dot(r_emb, whead[2 * H:3 * H], preferred_element_type=f32)
              + bhead_ref[...])                          # (B, IN_DIM)
    pred_ref[...] = logits

    m = jnp.max(logits, axis=-1, keepdims=True)
    lse = m + jnp.log(jnp.sum(jnp.exp(logits - m), axis=-1, keepdims=True))
    logit_y = jnp.sum(logits * oh_t, axis=-1, keepdims=True)
    per_sample = lse - logit_y                           # (B, 1)
    loss_ref[...] = jnp.sum(per_sample, axis=0, keepdims=True) * (1.0 / B)   # (1, 1)


def _renet_call():
    in_specs = [
        pl.BlockSpec((IN_DIM, H), lambda g: (0, 0)),                 # ent_embeds (shared)
        pl.BlockSpec((NUM_RELS, H), lambda g: (0, 0)),               # rel_embeds (shared)
        pl.BlockSpec((None, B, 1), lambda g: (g, 0, 0)),             # entity ids
        pl.BlockSpec((None, B, 1), lambda g: (g, 0, 0)),             # relation ids
        pl.BlockSpec((None, B, 1), lambda g: (g, 0, 0)),             # CE target ids
        pl.BlockSpec((None, T * B, NB), lambda g: (g, 0, 0)),        # neighbour ids
        pl.BlockSpec((None, T * B, NB), lambda g: (g, 0, 0)),        # neighbour mask
        pl.BlockSpec((None, B, 1), lambda g: (g, 0, 0)),             # history lengths
        pl.BlockSpec((None, 3, 3 * H, H), lambda g: (g, 0, 0, 0)),   # W_ih^T per gate
        pl.BlockSpec((None, 3, H, H), lambda g: (g, 0, 0, 0)),       # W_hh^T per gate
        pl.BlockSpec((None, 3, 1, H), lambda g: (g, 0, 0, 0)),       # b_ih per gate
        pl.BlockSpec((None, 3, 1, H), lambda g: (g, 0, 0, 0)),       # b_hh per gate
        pl.BlockSpec((None, 3 * H, IN_DIM), lambda g: (g, 0, 0)),    # head W^T
        pl.BlockSpec((None, 1, IN_DIM), lambda g: (g, 0, 0)),        # head b
    ]
    out_specs = (
        pl.BlockSpec((None, B, IN_DIM), lambda g: (g, 0, 0)),        # logits per path
        pl.BlockSpec((None, 1, 1), lambda g: (g, 0, 0)),             # mean CE per path
    )
    out_shape = (jax.ShapeDtypeStruct((2, B, IN_DIM), jnp.float32),
                 jax.ShapeDtypeStruct((2, 1, 1), jnp.float32))
    return pl.pallas_call(
        renet_fused_kernel,
        grid=(2,),
        in_specs=in_specs,
        out_specs=out_specs,
        out_shape=out_shape,
        compiler_params=pltpu.CompilerParams(dimension_semantics=("parallel",)),
        cost_estimate=pl.CostEstimate(flops=1_200_000, transcendentals=8_000,
                                      bytes_accessed=200_000),
    )


# ------------------------------ forward (glue) ---------------------------------
def renet_forward(params, triplets,
                  s_hist_ids, s_hist_nbmask, s_hist_len,
                  o_hist_ids, o_hist_nbmask, o_hist_len):
    s, r, o = triplets[:, 0], triplets[:, 1], triplets[:, 2]
    # sort by history length, descending (torch: .sort(0, descending=True))
    s_idx = jnp.argsort(-s_hist_len)
    o_idx = jnp.argsort(-o_hist_len)

    def prep(idx, ent_ids, tgt_ids, hist_ids, nbmask, lens):
        eid = ent_ids[idx][:, None].astype(jnp.int32)                       # (B,1)
        rid = r[idx][:, None].astype(jnp.int32)                             # (B,1)
        tgt = tgt_ids[idx][:, None].astype(jnp.int32)                       # (B,1)
        ln = lens[idx][:, None].astype(jnp.int32)                           # (B,1)
        hi = jnp.transpose(hist_ids[idx], (1, 0, 2)).reshape(T * B, NB)     # t-major
        nm = jnp.transpose(nbmask[idx], (1, 0, 2)).reshape(T * B, NB)
        return eid, rid, tgt, ln, hi.astype(jnp.int32), nm.astype(jnp.float32)

    # path 0 = subject side (sub_encoder / linear_sub / target o[s_idx])
    e0, r0, t0, l0, h0, m0 = prep(s_idx, s, o, s_hist_ids, s_hist_nbmask, s_hist_len)
    # path 1 = object side  (ob_encoder / linear_ob / target s[o_idx])
    e1, r1, t1, l1, h1, m1 = prep(o_idx, o, s, o_hist_ids, o_hist_nbmask, o_hist_len)

    eids = jnp.stack([e0, e1])
    rids = jnp.stack([r0, r1])
    tgts = jnp.stack([t0, t1])
    lens = jnp.stack([l0, l1])
    hist = jnp.stack([h0, h1])
    nbm = jnp.stack([m0, m1])

    preds, losses = _renet_call()(
        params["ent_embeds"], params["rel_embeds"],
        eids, rids, tgts, hist, nbm, lens,
        params["gru_wih"], params["gru_whh"], params["gru_bih"], params["gru_bhh"],
        params["w_head"], params["b_head"])

    ob_pred = preds[0]
    sub_pred = preds[1]
    loss = losses[0, 0, 0] + losses[1, 0, 0]
    return loss, sub_pred, ob_pred, o_idx, s_idx


# ------------------------------ parameter init ---------------------------------
def init_params(key):
    ks = jax.random.split(key, 8)
    gain = 2.0 ** 0.5  # calculate_gain('relu')

    def xavier(k, shape):
        bound = gain * (6.0 / (shape[0] + shape[1])) ** 0.5
        return jax.random.uniform(k, shape, jnp.float32, -bound, bound)

    gru_b = 1.0 / (H ** 0.5)
    lin_b = 1.0 / ((3 * H) ** 0.5)
    return {
        "ent_embeds": xavier(ks[0], (IN_DIM, H)),
        "rel_embeds": xavier(ks[1], (NUM_RELS, H)),
        # GRU weights: leading axis 0 = {sub_encoder, ob_encoder}, axis 1 = gate {r,z,n},
        # stored pre-transposed: W_ih^T (3H_in, H), W_hh^T (H, H), biases (1, H).
        "gru_wih": jax.random.uniform(ks[2], (2, 3, 3 * H, H), jnp.float32, -gru_b, gru_b),
        "gru_whh": jax.random.uniform(ks[3], (2, 3, H, H), jnp.float32, -gru_b, gru_b),
        "gru_bih": jax.random.uniform(ks[4], (2, 3, 1, H), jnp.float32, -gru_b, gru_b),
        "gru_bhh": jax.random.uniform(ks[5], (2, 3, 1, H), jnp.float32, -gru_b, gru_b),
        # Linear heads: leading axis = {linear_sub, linear_ob}; W^T (3H, in_dim), b (1, in_dim)
        "w_head": jax.random.uniform(ks[6], (2, 3 * H, IN_DIM), jnp.float32, -lin_b, lin_b),
        "b_head": jax.random.uniform(ks[7], (2, 1, IN_DIM), jnp.float32, -lin_b, lin_b),
    }


# ------------------------------------ main --------------------------------------
if __name__ == "__main__":
    key = jax.random.PRNGKey(0)
    kp, k1, k2, k3, k4 = jax.random.split(key, 5)

    params = init_params(kp)

    # triplets: (B, 3) = (subject, relation, object)
    triplets = jnp.stack([
        jax.random.randint(k1, (B,), 0, IN_DIM),
        jax.random.randint(k2, (B,), 0, NUM_RELS),
        jax.random.randint(k3, (B,), 0, IN_DIM),
    ], axis=1).astype(jnp.int32)

    # padded histories: neighbor entity ids per (sample, timestep), with per-sample
    # number of valid timesteps (some zero-length, mirroring the torch.cat-with-zeros path)
    s_hist_len = jnp.array([3, 0, 2, 4, 1, 0, 4, 2], dtype=jnp.int32)
    o_hist_len = jnp.array([0, 4, 1, 2, 3, 4, 0, 1], dtype=jnp.int32)
    s_hist_ids = jax.random.randint(k4, (B, T, NB), 0, IN_DIM).astype(jnp.int32)
    o_hist_ids = jax.random.randint(jax.random.fold_in(k4, 1), (B, T, NB), 0, IN_DIM).astype(jnp.int32)
    s_hist_nbmask = jnp.ones((B, T, NB), jnp.float32)
    o_hist_nbmask = jnp.ones((B, T, NB), jnp.float32)

    fwd = jax.jit(renet_forward)
    loss, sub_pred, ob_pred, o_idx, s_idx = fwd(
        params, triplets,
        s_hist_ids, s_hist_nbmask, s_hist_len,
        o_hist_ids, o_hist_nbmask, o_hist_len)

    jax.block_until_ready((loss, sub_pred, ob_pred, o_idx, s_idx))
    assert ob_pred.shape == (B, IN_DIM) and sub_pred.shape == (B, IN_DIM)
    assert jnp.isfinite(loss)
    print("KERNEL_OK")
</pallas_src>

<mosaic_0001>
module attributes {stable_mosaic.version = 11 : i64} {
  func.func @renet_fused_kernel(%arg0: i32, %arg1: memref<16x32xf32, #tpu.memory_space<vmem>>, %arg2: memref<8x32xf32, #tpu.memory_space<vmem>>, %arg3: memref<1x8x1xi32, #tpu.memory_space<vmem>>, %arg4: memref<1x8x1xi32, #tpu.memory_space<vmem>>, %arg5: memref<1x8x1xi32, #tpu.memory_space<vmem>>, %arg6: memref<1x32x3xi32, #tpu.memory_space<vmem>>, %arg7: memref<1x32x3xf32, #tpu.memory_space<vmem>>, %arg8: memref<1x8x1xi32, #tpu.memory_space<vmem>>, %arg9: memref<1x3x96x32xf32, #tpu.memory_space<vmem>>, %arg10: memref<1x3x32x32xf32, #tpu.memory_space<vmem>>, %arg11: memref<1x3x1x32xf32, #tpu.memory_space<vmem>>, %arg12: memref<1x3x1x32xf32, #tpu.memory_space<vmem>>, %arg13: memref<1x96x16xf32, #tpu.memory_space<vmem>>, %arg14: memref<1x1x16xf32, #tpu.memory_space<vmem>>, %arg15: memref<1x8x16xf32, #tpu.memory_space<vmem>>, %arg16: memref<1x1x1xf32, #tpu.memory_space<vmem>>) attributes {dimension_semantics = [#tpu.dimension_semantics<parallel>], iteration_bounds = array<i64: 2>, scalar_prefetch = 0 : i64, scratch_operands = 0 : i64, tpu.core_type = #tpu.core_type<tc>, window_params = [{pipeline_mode = #tpu.pipeline_mode<synchronous>, transform_indices = @transform_0, window_bounds = array<i64: 16, 32>}, {pipeline_mode = #tpu.pipeline_mode<synchronous>, transform_indices = @transform_1, window_bounds = array<i64: 8, 32>}, {transform_indices = @transform_2, window_bounds = array<i64: 1, 8, 1>}, {transform_indices = @transform_3, window_bounds = array<i64: 1, 8, 1>}, {transform_indices = @transform_4, window_bounds = array<i64: 1, 8, 1>}, {transform_indices = @transform_5, window_bounds = array<i64: 1, 32, 3>}, {transform_indices = @transform_6, window_bounds = array<i64: 1, 32, 3>}, {transform_indices = @transform_7, window_bounds = array<i64: 1, 8, 1>}, {transform_indices = @transform_8, window_bounds = array<i64: 1, 3, 96, 32>}, {transform_indices = @transform_9, window_bounds = array<i64: 1, 3, 32, 32>}, {transform_indices = @transform_10, window_bounds = array<i64: 1, 3, 1, 32>}, {transform_indices = @transform_11, window_bounds = array<i64: 1, 3, 1, 32>}, {transform_indices = @transform_12, window_bounds = array<i64: 1, 96, 16>}, {transform_indices = @transform_13, window_bounds = array<i64: 1, 1, 16>}, {transform_indices = @transform_14, window_bounds = array<i64: 1, 8, 16>}, {transform_indices = @transform_15, window_bounds = array<i64: 1, 1, 1>}]} {
    %c0 = arith.constant 0 : index
    %c0_0 = arith.constant 0 : index
    %0 = vector.load %arg1[%c0, %c0_0] : memref<16x32xf32, #tpu.memory_space<vmem>>, vector<16x32xf32>
    %c0_1 = arith.constant 0 : index
    %c0_2 = arith.constant 0 : index
    %1 = vector.load %arg2[%c0_1, %c0_2] : memref<8x32xf32, #tpu.memory_space<vmem>>, vector<8x32xf32>
    %2 = tpu.iota {dimensions = array<i32: 1>} : vector<8x16xi32>
    %3 = tpu.iota {dimensions = array<i32: 1>} : vector<8x8xi32>
    %c0_3 = arith.constant 0 : index
    %c0_4 = arith.constant 0 : index
    %c0_5 = arith.constant 0 : index
    %4 = vector.load %arg3[%c0_3, %c0_4, %c0_5] : memref<1x8x1xi32, #tpu.memory_space<vmem>>, vector<1x8x1xi32>
    %5 = vector.shape_cast %4 : vector<1x8x1xi32> to vector<8x1xi32>
    %6 = vector.broadcast %5 : vector<8x1xi32> to vector<8x16xi32>
    %7 = arith.cmpi eq, %2, %6 : vector<8x16xi32>
    %cst = arith.constant 1.000000e+00 : f32
    %cst_6 = arith.constant 0.000000e+00 : f32
    %8 = vector.broadcast %cst : f32 to vector<8x16xf32>
    %9 = vector.broadcast %cst_6 : f32 to vector<8x16xf32>
    %10 = arith.select %7, %8, %9 : vector<8x16xi1>, vector<8x16xf32>
    %c0_7 = arith.constant 0 : index
    %c0_8 = arith.constant 0 : index
    %c0_9 = arith.constant 0 : index
    %11 = vector.load %arg4[%c0_7, %c0_8, %c0_9] : memref<1x8x1xi32, #tpu.memory_space<vmem>>, vector<1x8x1xi32>
    %12 = vector.shape_cast %11 : vector<1x8x1xi32> to vector<8x1xi32>
    %13 = vector.broadcast %12 : vector<8x1xi32> to vector<8x8xi32>
    %14 = arith.cmpi eq, %3, %13 : vector<8x8xi32>
    %cst_10 = arith.constant 1.000000e+00 : f32
    %cst_11 = arith.constant 0.000000e+00 : f32
    %15 = vector.broadcast %cst_10 : f32 to vector<8x8xf32>
    %16 = vector.broadcast %cst_11 : f32 to vector<8x8xf32>
    %17 = arith.select %14, %15, %16 : vector<8x8xi1>, vector<8x8xf32>
    %c0_12 = arith.constant 0 : index
    %c0_13 = arith.constant 0 : index
    %c0_14 = arith.constant 0 : index
    %18 = vector.load %arg5[%c0_12, %c0_13, %c0_14] : memref<1x8x1xi32, #tpu.memory_space<vmem>>, vector<1x8x1xi32>
    %19 = vector.shape_cast %18 : vector<1x8x1xi32> to vector<8x1xi32>
    %20 = vector.broadcast %19 : vector<8x1xi32> to vector<8x16xi32>
    %21 = arith.cmpi eq, %2, %20 : vector<8x16xi32>
    %cst_15 = arith.constant 1.000000e+00 : f32
    %cst_16 = arith.constant 0.000000e+00 : f32
    %22 = vector.broadcast %cst_15 : f32 to vector<8x16xf32>
    %23 = vector.broadcast %cst_16 : f32 to vector<8x16xf32>
    %24 = arith.select %21, %22, %23 : vector<8x16xi1>, vector<8x16xf32>
    %cst_17 = arith.constant dense<0.000000e+00> : vector<8x32xf32>
    %25 = tpu.matmul %10, %0, %cst_17 {dimension_numbers = #tpu.dot_dimension_numbers<[1], [0], [0], [1], [0, 0, 1, 1], [], []>} : vector<8x16xf32>, vector<16x32xf32>, vector<8x32xf32> -> vector<8x32xf32>
    %cst_18 = arith.constant dense<0.000000e+00> : vector<8x32xf32>
    %26 = tpu.matmul %17, %1, %cst_18 {dimension_numbers = #tpu.dot_dimension_numbers<[1], [0], [0], [1], [0, 0, 1, 1], [], []>} : vector<8x8xf32>, vector<8x32xf32>, vector<8x32xf32> -> vector<8x32xf32>
    %c0_19 = arith.constant 0 : index
    %c0_20 = arith.constant 0 : index
    %c0_21 = arith.constant 0 : index
    %27 = vector.load %arg6[%c0_19, %c0_20, %c0_21] : memref<1x32x3xi32, #tpu.memory_space<vmem>>, vector<1x32x3xi32>
    %28 = vector.shape_cast %27 : vector<1x32x3xi32> to vector<32x3xi32>
    %c0_22 = arith.constant 0 : index
    %c0_23 = arith.constant 0 : index
    %c0_24 = arith.constant 0 : index
    %29 = vector.load %arg7[%c0_22, %c0_23, %c0_24] : memref<1x32x3xf32, #tpu.memory_space<vmem>>, vector<1x32x3xf32>
    %30 = vector.shape_cast %29 : vector<1x32x3xf32> to vector<32x3xf32>
    %31 = tpu.iota {dimensions = array<i32: 1>} : vector<32x16xi32>
    %cst_25 = arith.constant 0.000000e+00 : f32
    %32 = vector.broadcast %cst_25 : f32 to vector<32x16xf32>
    %33 = vector.extract_strided_slice %28 {offsets = [0, 0], sizes = [32, 1], strides = [1, 1]} : vector<32x3xi32> to vector<32x1xi32>
    %34 = vector.broadcast %33 : vector<32x1xi32> to vector<32x16xi32>
    %35 = arith.cmpi eq, %31, %34 : vector<32x16xi32>
    %36 = vector.extract_strided_slice %30 {offsets = [0, 0], sizes = [32, 1], strides = [1, 1]} : vector<32x3xf32> to vector<32x1xf32>
    %cst_26 = arith.constant 0.000000e+00 : f32
    %37 = vector.shape_cast %36 : vector<32x1xf32> to vector<32x1xf32>
    %38 = vector.broadcast %37 : vector<32x1xf32> to vector<32x16xf32>
    %39 = vector.broadcast %cst_26 : f32 to vector<32x16xf32>
    %40 = arith.select %35, %38, %39 : vector<32x16xi1>, vector<32x16xf32>
    %41 = arith.addf %32, %40 : vector<32x16xf32>
    %42 = vector.extract_strided_slice %28 {offsets = [0, 1], sizes = [32, 1], strides = [1, 1]} : vector<32x3xi32> to vector<32x1xi32>
    %43 = vector.broadcast %42 : vector<32x1xi32> to vector<32x16xi32>
    %44 = arith.cmpi eq, %31, %43 : vector<32x16xi32>
    %45 = vector.extract_strided_slice %30 {offsets = [0, 1], sizes = [32, 1], strides = [1, 1]} : vector<32x3xf32> to vector<32x1xf32>
    %cst_27 = arith.constant 0.000000e+00 : f32
    %46 = vector.shape_cast %45 : vector<32x1xf32> to vector<32x1xf32>
    %47 = vector.broadcast %46 : vector<32x1xf32> to vector<32x16xf32>
    %48 = vector.broadcast %cst_27 : f32 to vector<32x16xf32>
    %49 = arith.select %44, %47, %48 : vector<32x16xi1>, vector<32x16xf32>
    %50 = arith.addf %41, %49 : vector<32x16xf32>
    %51 = vector.extract_strided_slice %28 {offsets = [0, 2], sizes = [32, 1], strides = [1, 1]} : vector<32x3xi32> to vector<32x1xi32>
    %52 = vector.broadcast %51 : vector<32x1xi32> to vector<32x16xi32>
    %53 = arith.cmpi eq, %31, %52 : vector<32x16xi32>
    %54 = vector.extract_strided_slice %30 {offsets = [0, 2], sizes = [32, 1], strides = [1, 1]} : vector<32x3xf32> to vector<32x1xf32>
    %cst_28 = arith.constant 0.000000e+00 : f32
    %55 = vector.shape_cast %54 : vector<32x1xf32> to vector<32x1xf32>
    %56 = vector.broadcast %55 : vector<32x1xf32> to vector<32x16xf32>
    %57 = vector.broadcast %cst_28 : f32 to vector<32x16xf32>
    %58 = arith.select %53, %56, %57 : vector<32x16xi1>, vector<32x16xf32>
    %59 = arith.addf %50, %58 : vector<32x16xf32>
    %cst_29 = arith.constant dense<0.000000e+00> : vector<32xf32>
    %60 = vector.multi_reduction <add>, %30, %cst_29 [1] : vector<32x3xf32> to vector<32xf32>
    %61 = vector.shape_cast %60 : vector<32xf32> to vector<32x1xf32>
    %cst_30 = arith.constant 1.000000e+00 : f32
    %62 = vector.broadcast %cst_30 : f32 to vector<32x1xf32>
    %63 = arith.maximumf %61, %62 : vector<32x1xf32>
    %64 = vector.broadcast %63 : vector<32x1xf32> to vector<32x16xf32>
    %65 = arith.divf %59, %64 : vector<32x16xf32>
    %cst_31 = arith.constant dense<0.000000e+00> : vector<32x32xf32>
    %66 = tpu.matmul %65, %0, %cst_31 {dimension_numbers = #tpu.dot_dimension_numbers<[1], [0], [0], [1], [0, 0, 1, 1], [], []>} : vector<32x16xf32>, vector<16x32xf32>, vector<32x32xf32> -> vector<32x32xf32>
    %c0_32 = arith.constant 0 : index
    %c0_33 = arith.constant 0 : index
    %c0_34 = arith.constant 0 : index
    %c0_35 = arith.constant 0 : index
    %67 = vector.load %arg9[%c0_32, %c0_33, %c0_34, %c0_35] : memref<1x3x96x32xf32, #tpu.memory_space<vmem>>, vector<1x1x96x32xf32>
    %68 = vector.shape_cast %67 : vector<1x1x96x32xf32> to vector<96x32xf32>
    %c0_36 = arith.constant 0 : index
    %c1 = arith.constant 1 : index
    %c0_37 = arith.constant 0 : index
    %c0_38 = arith.constant 0 : index
    %69 = vector.load %arg9[%c0_36, %c1, %c0_37, %c0_38] : memref<1x3x96x32xf32, #tpu.memory_space<vmem>>, vector<1x1x96x32xf32>
    %70 = vector.shape_cast %69 : vector<1x1x96x32xf32> to vector<96x32xf32>
    %c0_39 = arith.constant 0 : index
    %c2 = arith.constant 2 : index
    %c0_40 = arith.constant 0 : index
    %c0_41 = arith.constant 0 : index
    %71 = vector.load %arg9[%c0_39, %c2, %c0_40, %c0_41] : memref<1x3x96x32xf32, #tpu.memory_space<vmem>>, vector<1x1x96x32xf32>
    %72 = vector.shape_cast %71 : vector<1x1x96x32xf32> to vector<96x32xf32>
    %73 = vector.extract_strided_slice %68 {offsets = [0, 0], sizes = [32, 32], strides = [1, 1]} : vector<96x32xf32> to vector<32x32xf32>
    %cst_42 = arith.constant dense<0.000000e+00> : vector<8x32xf32>
    %74 = tpu.matmul %25, %73, %cst_42 {dimension_numbers = #tpu.dot_dimension_numbers<[1], [0], [0], [1], [0, 0, 1, 1], [], []>} : vector<8x32xf32>, vector<32x32xf32>, vector<8x32xf32> -> vector<8x32xf32>
    %75 = vector.extract_strided_slice %68 {offsets = [64, 0], sizes = [32, 32], strides = [1, 1]} : vector<96x32xf32> to vector<32x32xf32>
    %cst_43 = arith.constant dense<0.000000e+00> : vector<8x32xf32>
    %76 = tpu.matmul %26, %75, %cst_43 {dimension_numbers = #tpu.dot_dimension_numbers<[1], [0], [0], [1], [0, 0, 1, 1], [], []>} : vector<8x32xf32>, vector<32x32xf32>, vector<8x32xf32> -> vector<8x32xf32>
    %77 = arith.addf %74, %76 : vector<8x32xf32>
    %c0_44 = arith.constant 0 : index
    %c0_45 = arith.constant 0 : index
    %c0_46 = arith.constant 0 : index
    %c0_47 = arith.constant 0 : index
    %78 = vector.load %arg11[%c0_44, %c0_45, %c0_46, %c0_47] : memref<1x3x1x32xf32, #tpu.memory_space<vmem>>, vector<1x1x1x32xf32>
    %79 = vector.shape_cast %78 : vector<1x1x1x32xf32> to vector<1x32xf32>
    %80 = vector.broadcast %79 : vector<1x32xf32> to vector<8x32xf32>
    %81 = arith.addf %77, %80 : vector<8x32xf32>
    %82 = vector.extract_strided_slice %70 {offsets = [0, 0], sizes = [32, 32], strides = [1, 1]} : vector<96x32xf32> to vector<32x32xf32>
    %cst_48 = arith.constant dense<0.000000e+00> : vector<8x32xf32>
    %83 = tpu.matmul %25, %82, %cst_48 {dimension_numbers = #tpu.dot_dimension_numbers<[1], [0], [0], [1], [0, 0, 1, 1], [], []>} : vector<8x32xf32>, vector<32x32xf32>, vector<8x32xf32> -> vector<8x32xf32>
    %84 = vector.extract_strided_slice %70 {offsets = [64, 0], sizes = [32, 32], strides = [1, 1]} : vector<96x32xf32> to vector<32x32xf32>
    %cst_49 = arith.constant dense<0.000000e+00> : vector<8x32xf32>
    %85 = tpu.matmul %26, %84, %cst_49 {dimension_numbers = #tpu.dot_dimension_numbers<[1], [0], [0], [1], [0, 0, 1, 1], [], []>} : vector<8x32xf32>, vector<32x32xf32>, vector<8x32xf32> -> vector<8x32xf32>
    %86 = arith.addf %83, %85 : vector<8x32xf32>
    %c0_50 = arith.constant 0 : index
    %c1_51 = arith.constant 1 : index
    %c0_52 = arith.constant 0 : index
    %c0_53 = arith.constant 0 : index
    %87 = vector.load %arg11[%c0_50, %c1_51, %c0_52, %c0_53] : memref<1x3x1x32xf32, #tpu.memory_space<vmem>>, vector<1x1x1x32xf32>
    %88 = vector.shape_cast %87 : vector<1x1x1x32xf32> to vector<1x32xf32>
    %89 = vector.broadcast %88 : vector<1x32xf32> to vector<8x32xf32>
    %90 = arith.addf %86, %89 : vector<8x32xf32>
    %91 = vector.extract_strided_slice %72 {offsets = [0, 0], sizes = [32, 32], strides = [1, 1]} : vector<96x32xf32> to vector<32x32xf32>
    %cst_54 = arith.constant dense<0.000000e+00> : vector<8x32xf32>
    %92 = tpu.matmul %25, %91, %cst_54 {dimension_numbers = #tpu.dot_dimension_numbers<[1], [0], [0], [1], [0, 0, 1, 1], [], []>} : vector<8x32xf32>, vector<32x32xf32>, vector<8x32xf32> -> vector<8x32xf32>
    %93 = vector.extract_strided_slice %72 {offsets = [64, 0], sizes = [32, 32], strides = [1, 1]} : vector<96x32xf32> to vector<32x32xf32>
    %cst_55 = arith.constant dense<0.000000e+00> : vector<8x32xf32>
    %94 = tpu.matmul %26, %93, %cst_55 {dimension_numbers = #tpu.dot_dimension_numbers<[1], [0], [0], [1], [0, 0, 1, 1], [], []>} : vector<8x32xf32>, vector<32x32xf32>, vector<8x32xf32> -> vector<8x32xf32>
    %95 = arith.addf %92, %94 : vector<8x32xf32>
    %c0_56 = arith.constant 0 : index
    %c2_57 = arith.constant 2 : index
    %c0_58 = arith.constant 0 : index
    %c0_59 = arith.constant 0 : index
    %96 = vector.load %arg11[%c0_56, %c2_57, %c0_58, %c0_59] : memref<1x3x1x32xf32, #tpu.memory_space<vmem>>, vector<1x1x1x32xf32>
    %97 = vector.shape_cast %96 : vector<1x1x1x32xf32> to vector<1x32xf32>
    %98 = vector.broadcast %97 : vector<1x32xf32> to vector<8x32xf32>
    %99 = arith.addf %95, %98 : vector<8x32xf32>
    %100 = vector.extract_strided_slice %68 {offsets = [32, 0], sizes = [32, 32], strides = [1, 1]} : vector<96x32xf32> to vector<32x32xf32>
    %cst_60 = arith.constant dense<0.000000e+00> : vector<32x32xf32>
    %101 = tpu.matmul %66, %100, %cst_60 {dimension_numbers = #tpu.dot_dimension_numbers<[1], [0], [0], [1], [0, 0, 1, 1], [], []>} : vector<32x32xf32>, vector<32x32xf32>, vector<32x32xf32> -> vector<32x32xf32>
    %102 = vector.extract_strided_slice %70 {offsets = [32, 0], sizes = [32, 32], strides = [1, 1]} : vector<96x32xf32> to vector<32x32xf32>
    %cst_61 = arith.constant dense<0.000000e+00> : vector<32x32xf32>
    %103 = tpu.matmul %66, %102, %cst_61 {dimension_numbers = #tpu.dot_dimension_numbers<[1], [0], [0], [1], [0, 0, 1, 1], [], []>} : vector<32x32xf32>, vector<32x32xf32>, vector<32x32xf32> -> vector<32x32xf32>
    %104 = vector.extract_strided_slice %72 {offsets = [32, 0], sizes = [32, 32], strides = [1, 1]} : vector<96x32xf32> to vector<32x32xf32>
    %cst_62 = arith.constant dense<0.000000e+00> : vector<32x32xf32>
    %105 = tpu.matmul %66, %104, %cst_62 {dimension_numbers = #tpu.dot_dimension_numbers<[1], [0], [0], [1], [0, 0, 1, 1], [], []>} : vector<32x32xf32>, vector<32x32xf32>, vector<32x32xf32> -> vector<32x32xf32>
    %c0_63 = arith.constant 0 : index
    %c0_64 = arith.constant 0 : index
    %c0_65 = arith.constant 0 : index
    %c0_66 = arith.constant 0 : index
    %106 = vector.load %arg10[%c0_63, %c0_64, %c0_65, %c0_66] : memref<1x3x32x32xf32, #tpu.memory_space<vmem>>, vector<1x1x32x32xf32>
    %107 = vector.shape_cast %106 : vector<1x1x32x32xf32> to vector<32x32xf32>
    %c0_67 = arith.constant 0 : index
    %c1_68 = arith.constant 1 : index
    %c0_69 = arith.constant 0 : index
    %c0_70 = arith.constant 0 : index
    %108 = vector.load %arg10[%c0_67, %c1_68, %c0_69, %c0_70] : memref<1x3x32x32xf32, #tpu.memory_space<vmem>>, vector<1x1x32x32xf32>
    %109 = vector.shape_cast %108 : vector<1x1x32x32xf32> to vector<32x32xf32>
    %c0_71 = arith.constant 0 : index
    %c2_72 = arith.constant 2 : index
    %c0_73 = arith.constant 0 : index
    %c0_74 = arith.constant 0 : index
    %110 = vector.load %arg10[%c0_71, %c2_72, %c0_73, %c0_74] : memref<1x3x32x32xf32, #tpu.memory_space<vmem>>, vector<1x1x32x32xf32>
    %111 = vector.shape_cast %110 : vector<1x1x32x32xf32> to vector<32x32xf32>
    %c0_75 = arith.constant 0 : index
    %c0_76 = arith.constant 0 : index
    %c0_77 = arith.constant 0 : index
    %c0_78 = arith.constant 0 : index
    %112 = vector.load %arg12[%c0_75, %c0_76, %c0_77, %c0_78] : memref<1x3x1x32xf32, #tpu.memory_space<vmem>>, vector<1x1x1x32xf32>
    %113 = vector.shape_cast %112 : vector<1x1x1x32xf32> to vector<1x32xf32>
    %c0_79 = arith.constant 0 : index
    %c1_80 = arith.constant 1 : index
    %c0_81 = arith.constant 0 : index
    %c0_82 = arith.constant 0 : index
    %114 = vector.load %arg12[%c0_79, %c1_80, %c0_81, %c0_82] : memref<1x3x1x32xf32, #tpu.memory_space<vmem>>, vector<1x1x1x32xf32>
    %115 = vector.shape_cast %114 : vector<1x1x1x32xf32> to vector<1x32xf32>
    %c0_83 = arith.constant 0 : index
    %c2_84 = arith.constant 2 : index
    %c0_85 = arith.constant 0 : index
    %c0_86 = arith.constant 0 : index
    %116 = vector.load %arg12[%c0_83, %c2_84, %c0_85, %c0_86] : memref<1x3x1x32xf32, #tpu.memory_space<vmem>>, vector<1x1x1x32xf32>
    %117 = vector.shape_cast %116 : vector<1x1x1x32xf32> to vector<1x32xf32>
    %c0_87 = arith.constant 0 : index
    %c0_88 = arith.constant 0 : index
    %c0_89 = arith.constant 0 : index
    %118 = vector.load %arg8[%c0_87, %c0_88, %c0_89] : memref<1x8x1xi32, #tpu.memory_space<vmem>>, vector<1x8x1xi32>
    %119 = vector.shape_cast %118 : vector<1x8x1xi32> to vector<8x1xi32>
    %cst_90 = arith.constant 0.000000e+00 : f32
    %120 = vector.broadcast %cst_90 : f32 to vector<8x32xf32>
    %cst_91 = arith.constant dense<0.000000e+00> : vector<8x32xf32>
    %121 = tpu.matmul %120, %107, %cst_91 {dimension_numbers = #tpu.dot_dimension_numbers<[1], [0], [0], [1], [0, 0, 1, 1], [], []>} : vector<8x32xf32>, vector<32x32xf32>, vector<8x32xf32> -> vector<8x32xf32>
    %122 = vector.broadcast %113 : vector<1x32xf32> to vector<8x32xf32>
    %123 = arith.addf %121, %122 : vector<8x32xf32>
    %cst_92 = arith.constant dense<0.000000e+00> : vector<8x32xf32>
    %124 = tpu.matmul %120, %109, %cst_92 {dimension_numbers = #tpu.dot_dimension_numbers<[1], [0], [0], [1], [0, 0, 1, 1], [], []>} : vector<8x32xf32>, vector<32x32xf32>, vector<8x32xf32> -> vector<8x32xf32>
    %125 = vector.broadcast %115 : vector<1x32xf32> to vector<8x32xf32>
    %126 = arith.addf %124, %125 : vector<8x32xf32>
    %cst_93 = arith.constant dense<0.000000e+00> : vector<8x32xf32>
    %127 = tpu.matmul %120, %111, %cst_93 {dimension_numbers = #tpu.dot_dimension_numbers<[1], [0], [0], [1], [0, 0, 1, 1], [], []>} : vector<8x32xf32>, vector<32x32xf32>, vector<8x32xf32> -> vector<8x32xf32>
    %128 = vector.broadcast %117 : vector<1x32xf32> to vector<8x32xf32>
    %129 = arith.addf %127, %128 : vector<8x32xf32>
    %130 = vector.extract_strided_slice %101 {offsets = [0, 0], sizes = [8, 32], strides = [1, 1]} : vector<32x32xf32> to vector<8x32xf32>
    %131 = arith.addf %81, %130 : vector<8x32xf32>
    %132 = arith.addf %131, %123 : vector<8x32xf32>
    %133 = arith.negf %132 : vector<8x32xf32>
    %134 = math.exp %133 : vector<8x32xf32>
    %cst_94 = arith.constant 1.000000e+00 : f32
    %135 = vector.broadcast %cst_94 : f32 to vector<8x32xf32>
    %136 = arith.addf %135, %134 : vector<8x32xf32>
    %137 = arith.divf %135, %136 : vector<8x32xf32>
    %138 = vector.extract_strided_slice %103 {offsets = [0, 0], sizes = [8, 32], strides = [1, 1]} : vector<32x32xf32> to vector<8x32xf32>
    %139 = arith.addf %90, %138 : vector<8x32xf32>
    %140 = arith.addf %139, %126 : vector<8x32xf32>
    %141 = arith.negf %140 : vector<8x32xf32>
    %142 = math.exp %141 : vector<8x32xf32>
    %cst_95 = arith.constant 1.000000e+00 : f32
    %143 = vector.broadcast %cst_95 : f32 to vector<8x32xf32>
    %144 = arith.addf %143, %142 : vector<8x32xf32>
    %145 = arith.divf %143, %144 : vector<8x32xf32>
    %146 = vector.extract_strided_slice %105 {offsets = [0, 0], sizes = [8, 32], strides = [1, 1]} : vector<32x32xf32> to vector<8x32xf32>
    %147 = arith.addf %99, %146 : vector<8x32xf32>
    %148 = arith.mulf %137, %129 : vector<8x32xf32>
    %149 = arith.addf %147, %148 : vector<8x32xf32>
    %150 = math.tanh %149 : vector<8x32xf32>
    %cst_96 = arith.constant 1.000000e+00 : f32
    %151 = vector.broadcast %cst_96 : f32 to vector<8x32xf32>
    %152 = arith.subf %151, %145 : vector<8x32xf32>
    %153 = arith.mulf %152, %150 : vector<8x32xf32>
    %154 = arith.mulf %145, %120 : vector<8x32xf32>
    %155 = arith.addf %153, %154 : vector<8x32xf32>
    %c0_i32 = arith.constant 0 : i32
    %156 = vector.broadcast %c0_i32 : i32 to vector<8x1xi32>
    %157 = arith.cmpi sgt, %119, %156 : vector<8x1xi32>
    %158 = vector.shape_cast %157 : vector<8x1xi1> to vector<8x1xi1>
    %159 = vector.broadcast %158 : vector<8x1xi1> to vector<8x32xi1>
    %160 = arith.select %159, %155, %120 : vector<8x32xi1>, vector<8x32xf32>
    %cst_97 = arith.constant dense<0.000000e+00> : vector<8x32xf32>
    %161 = tpu.matmul %160, %107, %cst_97 {dimension_numbers = #tpu.dot_dimension_numbers<[1], [0], [0], [1], [0, 0, 1, 1], [], []>} : vector<8x32xf32>, vector<32x32xf32>, vector<8x32xf32> -> vector<8x32xf32>
    %162 = vector.broadcast %113 : vector<1x32xf32> to vector<8x32xf32>
    %163 = arith.addf %161, %162 : vector<8x32xf32>
    %cst_98 = arith.constant dense<0.000000e+00> : vector<8x32xf32>
    %164 = tpu.matmul %160, %109, %cst_98 {dimension_numbers = #tpu.dot_dimension_numbers<[1], [0], [0], [1], [0, 0, 1, 1], [], []>} : vector<8x32xf32>, vector<32x32xf32>, vector<8x32xf32> -> vector<8x32xf32>
    %165 = vector.broadcast %115 : vector<1x32xf32> to vector<8x32xf32>
    %166 = arith.addf %164, %165 : vector<8x32xf32>
    %cst_99 = arith.constant dense<0.000000e+00> : vector<8x32xf32>
    %167 = tpu.matmul %160, %111, %cst_99 {dimension_numbers = #tpu.dot_dimension_numbers<[1], [0], [0], [1], [0, 0, 1, 1], [], []>} : vector<8x32xf32>, vector<32x32xf32>, vector<8x32xf32> -> vector<8x32xf32>
    %168 = vector.broadcast %117 : vector<1x32xf32> to vector<8x32xf32>
    %169 = arith.addf %167, %168 : vector<8x32xf32>
    %170 = vector.extract_strided_slice %101 {offsets = [8, 0], sizes = [8, 32], strides = [1, 1]} : vector<32x32xf32> to vector<8x32xf32>
    %171 = arith.addf %81, %170 : vector<8x32xf32>
    %172 = arith.addf %171, %163 : vector<8x32xf32>
    %173 = arith.negf %172 : vector<8x32xf32>
    %174 = math.exp %173 : vector<8x32xf32>
    %cst_100 = arith.constant 1.000000e+00 : f32
    %175 = vector.broadcast %cst_100 : f32 to vector<8x32xf32>
    %176 = arith.addf %175, %174 : vector<8x32xf32>
    %177 = arith.divf %175, %176 : vector<8x32xf32>
    %178 = vector.extract_strided_slice %103 {offsets = [8, 0], sizes = [8, 32], strides = [1, 1]} : vector<32x32xf32> to vector<8x32xf32>
    %179 = arith.addf %90, %178 : vector<8x32xf32>
    %180 = arith.addf %179, %166 : vector<8x32xf32>
    %181 = arith.negf %180 : vector<8x32xf32>
    %182 = math.exp %181 : vector<8x32xf32>
    %cst_101 = arith.constant 1.000000e+00 : f32
    %183 = vector.broadcast %cst_101 : f32 to vector<8x32xf32>
    %184 = arith.addf %183, %182 : vector<8x32xf32>
    %185 = arith.divf %183, %184 : vector<8x32xf32>
    %186 = vector.extract_strided_slice %105 {offsets = [8, 0], sizes = [8, 32], strides = [1, 1]} : vector<32x32xf32> to vector<8x32xf32>
    %187 = arith.addf %99, %186 : vector<8x32xf32>
    %188 = arith.mulf %177, %169 : vector<8x32xf32>
    %189 = arith.addf %187, %188 : vector<8x32xf32>
    %190 = math.tanh %189 : vector<8x32xf32>
    %cst_102 = arith.constant 1.000000e+00 : f32
    %191 = vector.broadcast %cst_102 : f32 to vector<8x32xf32>
    %192 = arith.subf %191, %185 : vector<8x32xf32>
    %193 = arith.mulf %192, %190 : vector<8x32xf32>
    %194 = arith.mulf %185, %160 : vector<8x32xf32>
    %195 = arith.addf %193, %194 : vector<8x32xf32>
    %c1_i32 = arith.constant 1 : i32
    %196 = vector.broadcast %c1_i32 : i32 to vector<8x1xi32>
    %197 = arith.cmpi sgt, %119, %196 : vector<8x1xi32>
    %198 = vector.shape_cast %197 : vector<8x1xi1> to vector<8x1xi1>
    %199 = vector.broadcast %198 : vector<8x1xi1> to vector<8x32xi1>
    %200 = arith.select %199, %195, %160 : vector<8x32xi1>, vector<8x32xf32>
    %cst_103 = arith.constant dense<0.000000e+00> : vector<8x32xf32>
    %201 = tpu.matmul %200, %107, %cst_103 {dimension_numbers = #tpu.dot_dimension_numbers<[1], [0], [0], [1], [0, 0, 1, 1], [], []>} : vector<8x32xf32>, vector<32x32xf32>, vector<8x32xf32> -> vector<8x32xf32>
    %202 = vector.broadcast %113 : vector<1x32xf32> to vector<8x32xf32>
    %203 = arith.addf %201, %202 : vector<8x32xf32>
    %cst_104 = arith.constant dense<0.000000e+00> : vector<8x32xf32>
    %204 = tpu.matmul %200, %109, %cst_104 {dimension_numbers = #tpu.dot_dimension_numbers<[1], [0], [0], [1], [0, 0, 1, 1], [], []>} : vector<8x32xf32>, vector<32x32xf32>, vector<8x32xf32> -> vector<8x32xf32>
    %205 = vector.broadcast %115 : vector<1x32xf32> to vector<8x32xf32>
    %206 = arith.addf %204, %205 : vector<8x32xf32>
    %cst_105 = arith.constant dense<0.000000e+00> : vector<8x32xf32>
    %207 = tpu.matmul %200, %111, %cst_105 {dimension_numbers = #tpu.dot_dimension_numbers<[1], [0], [0], [1], [0, 0, 1, 1], [], []>} : vector<8x32xf32>, vector<32x32xf32>, vector<8x32xf32> -> vector<8x32xf32>
    %208 = vector.broadcast %117 : vector<1x32xf32> to vector<8x32xf32>
    %209 = arith.addf %207, %208 : vector<8x32xf32>
    %210 = vector.extract_strided_slice %101 {offsets = [16, 0], sizes = [8, 32], strides = [1, 1]} : vector<32x32xf32> to vector<8x32xf32>
    %211 = arith.addf %81, %210 : vector<8x32xf32>
    %212 = arith.addf %211, %203 : vector<8x32xf32>
    %213 = arith.negf %212 : vector<8x32xf32>
    %214 = math.exp %213 : vector<8x32xf32>
    %cst_106 = arith.constant 1.000000e+00 : f32
    %215 = vector.broadcast %cst_106 : f32 to vector<8x32xf32>
    %216 = arith.addf %215, %214 : vector<8x32xf32>
    %217 = arith.divf %215, %216 : vector<8x32xf32>
    %218 = vector.extract_strided_slice %103 {offsets = [16, 0], sizes = [8, 32], strides = [1, 1]} : vector<32x32xf32> to vector<8x32xf32>
    %219 = arith.addf %90, %218 : vector<8x32xf32>
    %220 = arith.addf %219, %206 : vector<8x32xf32>
    %221 = arith.negf %220 : vector<8x32xf32>
    %222 = math.exp %221 : vector<8x32xf32>
    %cst_107 = arith.constant 1.000000e+00 : f32
    %223 = vector.broadcast %cst_107 : f32 to vector<8x32xf32>
    %224 = arith.addf %223, %222 : vector<8x32xf32>
    %225 = arith.divf %223, %224 : vector<8x32xf32>
    %226 = vector.extract_strided_slice %105 {offsets = [16, 0], sizes = [8, 32], strides = [1, 1]} : vector<32x32xf32> to vector<8x32xf32>
    %227 = arith.addf %99, %226 : vector<8x32xf32>
    %228 = arith.mulf %217, %209 : vector<8x32xf32>
    %229 = arith.addf %227, %228 : vector<8x32xf32>
    %230 = math.tanh %229 : vector<8x32xf32>
    %cst_108 = arith.constant 1.000000e+00 : f32
    %231 = vector.broadcast %cst_108 : f32 to vector<8x32xf32>
    %232 = arith.subf %231, %225 : vector<8x32xf32>
    %233 = arith.mulf %232, %230 : vector<8x32xf32>
    %234 = arith.mulf %225, %200 : vector<8x32xf32>
    %235 = arith.addf %233, %234 : vector<8x32xf32>
    %c2_i32 = arith.constant 2 : i32
    %236 = vector.broadcast %c2_i32 : i32 to vector<8x1xi32>
    %237 = arith.cmpi sgt, %119, %236 : vector<8x1xi32>
    %238 = vector.shape_cast %237 : vector<8x1xi1> to vector<8x1xi1>
    %239 = vector.broadcast %238 : vector<8x1xi1> to vector<8x32xi1>
    %240 = arith.select %239, %235, %200 : vector<8x32xi1>, vector<8x32xf32>
    %cst_109 = arith.constant dense<0.000000e+00> : vector<8x32xf32>
    %241 = tpu.matmul %240, %107, %cst_109 {dimension_numbers = #tpu.dot_dimension_numbers<[1], [0], [0], [1], [0, 0, 1, 1], [], []>} : vector<8x32xf32>, vector<32x32xf32>, vector<8x32xf32> -> vector<8x32xf32>
    %242 = vector.broadcast %113 : vector<1x32xf32> to vector<8x32xf32>
    %243 = arith.addf %241, %242 : vector<8x32xf32>
    %cst_110 = arith.constant dense<0.000000e+00> : vector<8x32xf32>
    %244 = tpu.matmul %240, %109, %cst_110 {dimension_numbers = #tpu.dot_dimension_numbers<[1], [0], [0], [1], [0, 0, 1, 1], [], []>} : vector<8x32xf32>, vector<32x32xf32>, vector<8x32xf32> -> vector<8x32xf32>
    %245 = vector.broadcast %115 : vector<1x32xf32> to vector<8x32xf32>
    %246 = arith.addf %244, %245 : vector<8x32xf32>
    %cst_111 = arith.constant dense<0.000000e+00> : vector<8x32xf32>
    %247 = tpu.matmul %240, %111, %cst_111 {dimension_numbers = #tpu.dot_dimension_numbers<[1], [0], [0], [1], [0, 0, 1, 1], [], []>} : vector<8x32xf32>, vector<32x32xf32>, vector<8x32xf32> -> vector<8x32xf32>
    %248 = vector.broadcast %117 : vector<1x32xf32> to vector<8x32xf32>
    %249 = arith.addf %247, %248 : vector<8x32xf32>
    %250 = vector.extract_strided_slice %101 {offsets = [24, 0], sizes = [8, 32], strides = [1, 1]} : vector<32x32xf32> to vector<8x32xf32>
    %251 = arith.addf %81, %250 : vector<8x32xf32>
    %252 = arith.addf %251, %243 : vector<8x32xf32>
    %253 = arith.negf %252 : vector<8x32xf32>
    %254 = math.exp %253 : vector<8x32xf32>
    %cst_112 = arith.constant 1.000000e+00 : f32
    %255 = vector.broadcast %cst_112 : f32 to vector<8x32xf32>
    %256 = arith.addf %255, %254 : vector<8x32xf32>
    %257 = arith.divf %255, %256 : vector<8x32xf32>
    %258 = vector.extract_strided_slice %103 {offsets = [24, 0], sizes = [8, 32], strides = [1, 1]} : vector<32x32xf32> to vector<8x32xf32>
    %259 = arith.addf %90, %258 : vector<8x32xf32>
    %260 = arith.addf %259, %246 : vector<8x32xf32>
    %261 = arith.negf %260 : vector<8x32xf32>
    %262 = math.exp %261 : vector<8x32xf32>
    %cst_113 = arith.constant 1.000000e+00 : f32
    %263 = vector.broadcast %cst_113 : f32 to vector<8x32xf32>
    %264 = arith.addf %263, %262 : vector<8x32xf32>
    %265 = arith.divf %263, %264 : vector<8x32xf32>
    %266 = vector.extract_strided_slice %105 {offsets = [24, 0], sizes = [8, 32], strides = [1, 1]} : vector<32x32xf32> to vector<8x32xf32>
    %267 = arith.addf %99, %266 : vector<8x32xf32>
    %268 = arith.mulf %257, %249 : vector<8x32xf32>
    %269 = arith.addf %267, %268 : vector<8x32xf32>
    %270 = math.tanh %269 : vector<8x32xf32>
    %cst_114 = arith.constant 1.000000e+00 : f32
    %271 = vector.broadcast %cst_114 : f32 to vector<8x32xf32>
    %272 = arith.subf %271, %265 : vector<8x32xf32>
    %273 = arith.mulf %272, %270 : vector<8x32xf32>
    %274 = arith.mulf %265, %240 : vector<8x32xf32>
    %275 = arith.addf %273, %274 : vector<8x32xf32>
    %c3_i32 = arith.constant 3 : i32
    %276 = vector.broadcast %c3_i32 : i32 to vector<8x1xi32>
    %277 = arith.cmpi sgt, %119, %276 : vector<8x1xi32>
    %278 = vector.shape_cast %277 : vector<8x1xi1> to vector<8x1xi1>
    %279 = vector.broadcast %278 : vector<8x1xi1> to vector<8x32xi1>
    %280 = arith.select %279, %275, %240 : vector<8x32xi1>, vector<8x32xf32>
    %c0_115 = arith.constant 0 : index
    %c0_116 = arith.constant 0 : index
    %c0_117 = arith.constant 0 : index
    %281 = vector.load %arg13[%c0_115, %c0_116, %c0_117] : memref<1x96x16xf32, #tpu.memory_space<vmem>>, vector<1x96x16xf32>
    %282 = vector.shape_cast %281 : vector<1x96x16xf32> to vector<96x16xf32>
    %283 = vector.extract_strided_slice %282 {offsets = [0, 0], sizes = [32, 16], strides = [1, 1]} : vector<96x16xf32> to vector<32x16xf32>
    %cst_118 = arith.constant dense<0.000000e+00> : vector<8x16xf32>
    %284 = tpu.matmul %25, %283, %cst_118 {dimension_numbers = #tpu.dot_dimension_numbers<[1], [0], [0], [1], [0, 0, 1, 1], [], []>} : vector<8x32xf32>, vector<32x16xf32>, vector<8x16xf32> -> vector<8x16xf32>
    %285 = vector.extract_strided_slice %282 {offsets = [32, 0], sizes = [32, 16], strides = [1, 1]} : vector<96x16xf32> to vector<32x16xf32>
    %cst_119 = arith.constant dense<0.000000e+00> : vector<8x16xf32>
    %286 = tpu.matmul %280, %285, %cst_119 {dimension_numbers = #tpu.dot_dimension_numbers<[1], [0], [0], [1], [0, 0, 1, 1], [], []>} : vector<8x32xf32>, vector<32x16xf32>, vector<8x16xf32> -> vector<8x16xf32>
    %287 = arith.addf %284, %286 : vector<8x16xf32>
    %288 = vector.extract_strided_slice %282 {offsets = [64, 0], sizes = [32, 16], strides = [1, 1]} : vector<96x16xf32> to vector<32x16xf32>
    %cst_120 = arith.constant dense<0.000000e+00> : vector<8x16xf32>
    %289 = tpu.matmul %26, %288, %cst_120 {dimension_numbers = #tpu.dot_dimension_numbers<[1], [0], [0], [1], [0, 0, 1, 1], [], []>} : vector<8x32xf32>, vector<32x16xf32>, vector<8x16xf32> -> vector<8x16xf32>
    %290 = arith.addf %287, %289 : vector<8x16xf32>
    %c0_121 = arith.constant 0 : index
    %c0_122 = arith.constant 0 : index
    %c0_123 = arith.constant 0 : index
    %291 = vector.load %arg14[%c0_121, %c0_122, %c0_123] : memref<1x1x16xf32, #tpu.memory_space<vmem>>, vector<1x1x16xf32>
    %292 = vector.shape_cast %291 : vector<1x1x16xf32> to vector<1x16xf32>
    %293 = vector.broadcast %292 : vector<1x16xf32> to vector<8x16xf32>
    %294 = arith.addf %290, %293 : vector<8x16xf32>
    %c0_124 = arith.constant 0 : index
    %c0_125 = arith.constant 0 : index
    %c0_126 = arith.constant 0 : index
    %295 = vector.load %arg15[%c0_124, %c0_125, %c0_126] : memref<1x8x16xf32, #tpu.memory_space<vmem>>, vector<1x8x16xf32>
    %296 = vector.shape_cast %295 : vector<1x8x16xf32> to vector<8x16xf32>
    %297 = vector.shape_cast %294 : vector<8x16xf32> to vector<1x8x16xf32>
    tpu.vector_store %arg15[%c0_124, %c0_125, %c0_126], %297 {strides = array<i32>} : memref<1x8x16xf32, #tpu.memory_space<vmem>>, vector<1x8x16xf32>,
    %cst_127 = arith.constant dense<0xFF800000> : vector<8xf32>
    %298 = vector.multi_reduction <maximumf>, %294, %cst_127 [1] : vector<8x16xf32> to vector<8xf32>
    %299 = vector.shape_cast %298 : vector<8xf32> to vector<8x1xf32>
    %300 = vector.broadcast %299 : vector<8x1xf32> to vector<8x16xf32>
    %301 = arith.subf %294, %300 : vector<8x16xf32>
    %302 = math.exp %301 : vector<8x16xf32>
    %cst_128 = arith.constant dense<0.000000e+00> : vector<8xf32>
    %303 = vector.multi_reduction <add>, %302, %cst_128 [1] : vector<8x16xf32> to vector<8xf32>
    %304 = vector.shape_cast %303 : vector<8xf32> to vector<8x1xf32>
    %305 = math.log %304 : vector<8x1xf32>
    %306 = arith.addf %299, %305 : vector<8x1xf32>
    %307 = arith.mulf %294, %24 : vector<8x16xf32>
    %cst_129 = arith.constant dense<0.000000e+00> : vector<8xf32>
    %308 = vector.multi_reduction <add>, %307, %cst_129 [1] : vector<8x16xf32> to vector<8xf32>
    %309 = vector.shape_cast %308 : vector<8xf32> to vector<8x1xf32>
    %310 = arith.subf %306, %309 : vector<8x1xf32>
    %cst_130 = arith.constant dense<0.000000e+00> : vector<1xf32>
    %311 = vector.multi_reduction <add>, %310, %cst_130 [0] : vector<8x1xf32> to vector<1xf32>
    %312 = vector.shape_cast %311 : vector<1xf32> to vector<1x1xf32>
    %cst_131 = arith.constant 1.250000e-01 : f32
    %313 = vector.broadcast %cst_131 : f32 to vector<1x1xf32>
    %314 = arith.mulf %312, %313 : vector<1x1xf32>
    %c0_132 = arith.constant 0 : index
    %c0_133 = arith.constant 0 : index
    %c0_134 = arith.constant 0 : index
    %315 = vector.load %arg16[%c0_132, %c0_133, %c0_134] : memref<1x1x1xf32, #tpu.memory_space<vmem>>, vector<1x1x1xf32>
    %316 = vector.shape_cast %315 : vector<1x1x1xf32> to vector<1x1xf32>
    %317 = vector.shape_cast %314 : vector<1x1xf32> to vector<1x1x1xf32>
    tpu.vector_store %arg16[%c0_132, %c0_133, %c0_134], %317 {strides = array<i32>} : memref<1x1x1xf32, #tpu.memory_space<vmem>>, vector<1x1x1xf32>,
    return
  }
  func.func @transform_0(%arg0: i32) -> (i32, i32) {
    %c0_i32 = arith.constant 0 : i32
    %c0_i32_0 = arith.constant 0 : i32
    %c0_i32_1 = arith.constant 0 : i32
    return %c0_i32, %c0_i32_0 : i32, i32
  }
  func.func @transform_1(%arg0: i32) -> (i32, i32) {
    %c0_i32 = arith.constant 0 : i32
    %c0_i32_0 = arith.constant 0 : i32
    %c0_i32_1 = arith.constant 0 : i32
    return %c0_i32, %c0_i32_0 : i32, i32
  }
  func.func @transform_2(%arg0: i32) -> (i32, i32, i32) {
    %c0_i32 = arith.constant 0 : i32
    %c0_i32_0 = arith.constant 0 : i32
    %c0_i32_1 = arith.constant 0 : i32
    return %arg0, %c0_i32, %c0_i32_0 : i32, i32, i32
  }
  func.func @transform_3(%arg0: i32) -> (i32, i32, i32) {
    %c0_i32 = arith.constant 0 : i32
    %c0_i32_0 = arith.constant 0 : i32
    %c0_i32_1 = arith.constant 0 : i32
    return %arg0, %c0_i32, %c0_i32_0 : i32, i32, i32
  }
  func.func @transform_4(%arg0: i32) -> (i32, i32, i32) {
    %c0_i32 = arith.constant 0 : i32
    %c0_i32_0 = arith.constant 0 : i32
    %c0_i32_1 = arith.constant 0 : i32
    return %arg0, %c0_i32, %c0_i32_0 : i32, i32, i32
  }
  func.func @transform_5(%arg0: i32) -> (i32, i32, i32) {
    %c0_i32 = arith.constant 0 : i32
    %c0_i32_0 = arith.constant 0 : i32
    %c0_i32_1 = arith.constant 0 : i32
    return %arg0, %c0_i32, %c0_i32_0 : i32, i32, i32
  }
  func.func @transform_6(%arg0: i32) -> (i32, i32, i32) {
    %c0_i32 = arith.constant 0 : i32
    %c0_i32_0 = arith.constant 0 : i32
    %c0_i32_1 = arith.constant 0 : i32
    return %arg0, %c0_i32, %c0_i32_0 : i32, i32, i32
  }
  func.func @transform_7(%arg0: i32) -> (i32, i32, i32) {
    %c0_i32 = arith.constant 0 : i32
    %c0_i32_0 = arith.constant 0 : i32
    %c0_i32_1 = arith.constant 0 : i32
    return %arg0, %c0_i32, %c0_i32_0 : i32, i32, i32
  }
  func.func @transform_8(%arg0: i32) -> (i32, i32, i32, i32) {
    %c0_i32 = arith.constant 0 : i32
    %c0_i32_0 = arith.constant 0 : i32
    %c0_i32_1 = arith.constant 0 : i32
    %c0_i32_2 = arith.constant 0 : i32
    return %arg0, %c0_i32, %c0_i32_0, %c0_i32_1 : i32, i32, i32, i32
  }
  func.func @transform_9(%arg0: i32) -> (i32, i32, i32, i32) {
    %c0_i32 = arith.constant 0 : i32
    %c0_i32_0 = arith.constant 0 : i32
    %c0_i32_1 = arith.constant 0 : i32
    %c0_i32_2 = arith.constant 0 : i32
    return %arg0, %c0_i32, %c0_i32_0, %c0_i32_1 : i32, i32, i32, i32
  }
  func.func @transform_10(%arg0: i32) -> (i32, i32, i32, i32) {
    %c0_i32 = arith.constant 0 : i32
    %c0_i32_0 = arith.constant 0 : i32
    %c0_i32_1 = arith.constant 0 : i32
    %c0_i32_2 = arith.constant 0 : i32
    return %arg0, %c0_i32, %c0_i32_0, %c0_i32_1 : i32, i32, i32, i32
  }
  func.func @transform_11(%arg0: i32) -> (i32, i32, i32, i32) {
    %c0_i32 = arith.constant 0 : i32
    %c0_i32_0 = arith.constant 0 : i32
    %c0_i32_1 = arith.constant 0 : i32
    %c0_i32_2 = arith.constant 0 : i32
    return %arg0, %c0_i32, %c0_i32_0, %c0_i32_1 : i32, i32, i32, i32
  }
  func.func @transform_12(%arg0: i32) -> (i32, i32, i32) {
    %c0_i32 = arith.constant 0 : i32
    %c0_i32_0 = arith.constant 0 : i32
    %c0_i32_1 = arith.constant 0 : i32
    return %arg0, %c0_i32, %c0_i32_0 : i32, i32, i32
  }
  func.func @transform_13(%arg0: i32) -> (i32, i32, i32) {
    %c0_i32 = arith.constant 0 : i32
    %c0_i32_0 = arith.constant 0 : i32
    %c0_i32_1 = arith.constant 0 : i32
    return %arg0, %c0_i32, %c0_i32_0 : i32, i32, i32
  }
  func.func @transform_14(%arg0: i32) -> (i32, i32, i32) {
    %c0_i32 = arith.constant 0 : i32
    %c0_i32_0 = arith.constant 0 : i32
    %c0_i32_1 = arith.constant 0 : i32
    return %arg0, %c0_i32, %c0_i32_0 : i32, i32, i32
  }
  func.func @transform_15(%arg0: i32) -> (i32, i32, i32) {
    %c0_i32 = arith.constant 0 : i32
    %c0_i32_0 = arith.constant 0 : i32
    %c0_i32_1 = arith.constant 0 : i32
    return %arg0, %c0_i32, %c0_i32_0 : i32, i32, i32
  }
}

</mosaic_0001>

<bundles_post_ra>
// kernel: neg.2
= control target key start
LH: loop header
LB: loop body
LE: loop exit
PB: predicated region body
PF: predicated region fallthrough
CT: control target
= control target key end

     0   :  { %s24_s0 = inlined_call_operand.vmem [shape: s32[8], index: 0, kind: input, shape index: {}]   ;;  %s25_s1 = inlined_call_operand.vmem [shape: s32[8], index: 1, kind: output, shape index: {}]  }
   0x1   :  { %v2_v0 = vld [vmem:[%s24_s0] sm:$0x1] }
   0x2   :  { %v5_v1 = vsub.s32 0, %v2_v0 }
   0x4   :  { %7 = vst [vmem:[%s25_s1] sm:$0x1] %v5_v1 }

// kernel: renet_forward.1
= control target key start
LH: loop header
LB: loop body
LE: loop exit
PB: predicated region body
PF: predicated region fallthrough
CT: control target
= control target key end

     0   :  { %s4239_s18 = smov 0   ;;  %s4684_s0 = inlined_call_operand.vmem [shape: f32[16,32], index: 0, kind: input, shape index: {}]   ;;  %s4685_s1 = inlined_call_operand.vmem [shape: f32[8,32], index: 1, kind: input, shape index: {}]   ;;  %s4686_s2 = inlined_call_operand.vmem [shape: s32[2,8,1], index: 2, kind: input, shape index: {}]   ;;  %s4687_s3 = inlined_call_operand.vmem [shape: s32[2,8,1], index: 3, kind: input, shape index: {}]   ;;  %s4688_s4 = inlined_call_operand.vmem [shape: s32[2,8,1], index: 4, kind: input, shape index: {}]   ;;  %s4689_s5 = inlined_call_operand.vmem [shape: s32[2,32,3], index: 5, kind: input, shape index: {}]   ;;  %s4690_s6 = inlined_call_operand.vmem [shape: f32[2,32,3], index: 6, kind: input, shape index: {}]   ;;  %s4691_s7 = inlined_call_operand.vmem [shape: s32[2,8,1], index: 7, kind: input, shape index: {}]   ;;  %s4692_s8 = inlined_call_operand.vmem [shape: f32[2,3,96,32], index: 8, kind: input, shape index: {}]   ;;  %s4693_s9 = inlined_call_operand.vmem [shape: f32[2,3,32,32], index: 9, kind: input, shape index: {}]   ;;  %s4694_s10 = inlined_call_operand.vmem [shape: f32[2,3,1,32], index: 10, kind: input, shape index: {}]   ;;  %s4695_s11 = inlined_call_operand.vmem [shape: f32[2,3,1,32], index: 11, kind: input, shape index: {}]   ;;  %s4696_s12 = inlined_call_operand.vmem [shape: f32[2,96,16], index: 12, kind: input, shape index: {}]   ;;  %s4697_s13 = inlined_call_operand.vmem [shape: f32[2,1,16], index: 13, kind: input, shape index: {}]   ;;  %s4698_s14 = inlined_call_operand.vmem [shape: f32[2,8,16], index: 14, kind: output, shape index: {0}]   ;;  %s4699_s15 = inlined_call_operand.vmem [shape: f32[2,1,1], index: 15, kind: output, shape index: {1}]  }
   0x1 LB: > { %s3363_s19 = sadd.s32 4294967295, %s4151_s18   ;;  %p3367_p0 = scmp.ge.s32.totalorder %s4151_s18, 1  ;;  %s4151_s18 = sphi %s4239_s18, %s26_s18  }
   0x2   : > { %p542_p1 = scmp.lt.s32.totalorder %s4151_s18, 3 }
   0x4   : > { %p543_p2 = pnand %p3367_p0, %p542_p1 }
   0x5   : > { %p639_p3 = scmp.lt.s32.totalorder (!%p543_p2), %s3363_s19, 1  ;;  %v4153_v0 = vmov (!%p543_p2), 1   ;;  %v4154_v1 = vmov (!%p543_p2), 0   ;;  %vm1001_vm0 = vcmask (!%p543_p2), 23552   ;;  %v4155_v13 = vmov (!%p543_p2), 0.0   ;;  %v700_v14 = vld [vmem:[%s4685_s1] sm:$0xff] (!%p543_p2) }
   0x6   : > { %546 = sbr.rel (%p543_p2) target bundleno = 2059 (0x80b), region = 76  ;;  %4081 = vset.pattern.permute.xlu0 (!%p543_p2), %v4153_v0  ;;  %4080 = vset.pattern.permute.xlu1 (!%p543_p2), %v4154_v1  ;;  %vm4156_vm1 = vmmov (!%p543_p2), 0   ;;  %v4157_v16 = vmov (!%p543_p2), 0.0|0.0   ;;  %v698_v17 = vld [vmem:[%s4684_s0] sm:$0xff] (!%p543_p2)  ;;  %v699_v18 = vld [vmem:[%s4684_s0 + $0x8] sm:$0xff] (!%p543_p2)  ;;  %v4158_v21 = vmov (!%p543_p2), 2   ;;  %v701_v26 = vlaneseq (!%p543_p2) }
   0x7   : > { %3618 = vmatprep.subr.mxu1 (!%p543_p2), %v4155_v13  ;;  %3620 = vmatprep.mubr.msk.f32.mxu1 (!%p543_p2), %vm4156_vm1, %v4155_v13  ;;  %v3907_v20 = vpack.c.bf16 (!%p543_p2), %v699_v18, %v698_v17  ;;  %vm795_vm2 = vcmask (!%p543_p2), 64512   ;;  %vm721_vm4 = vcmask (!%p543_p2), 130048  }
   0x8   : > { %3619 = vmatpush3.msra.mxu1 (!%p543_p2), %v700_v14  ;;  %3615 = vmatprep.mubr.msk.f32.mxu0 (!%p543_p2), %vm4156_vm1, %v4155_v13  ;;  %v4308_v29 = vand.u32 (!%p543_p2), 127, %v701_v26 }
   0x9   : > { %3906 = vmatprep.subr.bf16.mxu0 (!%p543_p2), %v4157_v16  ;;  %3910 = vmatprep.subr.bf16.mxu1 (!%p543_p2), %v3907_v20 }
   0xa   : > { %3908 = vmatpush3.bf16.msra.mxu0 (!%p543_p2), %v3907_v20 }
   0xb   : > { %3913 = vmatprep.subr.bf16.mxu0 (!%p543_p2), %v4157_v16 }
   0xd   : > { %s4701_s19 = smov (!%p639_p3, %s3363_s19), 1 }
   0xe   : > { %s3469_s20 = sshll.u32 %s4701_s19, 5  ;;  %s4264_s27 = sshll.u32 %s4701_s19, 3 }
   0xf   : > { %s660_s23 = scalar_lea.vmem %s4690_s6, %s3469_s20  ;;  %s4261_s26 = scalar_lea.vmem %s4689_s5, %s3469_s20 }
  0x10   : > { %v874_v2 = vld [vmem:[%s660_s23 + $0x8] sm:$0xff]  ;;  %v873_v3 = vld [vmem:[%s660_s23] sm:$0xff]  ;;  %v4255_v4 = vld [vmem:[%s660_s23 + $0x10] sm:$0xff]  ;;  %s646_s30 = scalar_lea.vmem %s4687_s3, %s4264_s27  ;;  %s642_s22 = scalar_lea.vmem %s4686_s2, %s4264_s27 }
  0x11   : > { %v1005_v5 = vsel %vm1001_vm0, %v874_v2, 0.0  ;;  %v1002_v6 = vsel %vm1001_vm0, %v873_v3, 0.0  ;;  %v1008_v7 = vsel %vm1001_vm0, %v4255_v4, 0.0  ;;  %v876_v8 = vld [vmem:[%s660_s23 + $0x18] sm:$0xff]  ;;  %v869_v10 = vld [vmem:[%s4261_s26] sm:$0xff]  ;;  %v870_v12 = vld [vmem:[%s4261_s26 + $0x8] sm:$0xff]  ;;  %s664_s21 = scalar_lea.vmem %s4691_s7, %s4264_s27  ;;  %s650_s24 = scalar_lea.vmem %s4688_s4, %s4264_s27 }
  0x12   : > { %1006 = vadd.xlane.f32.xlu1 %v1005_v5  ;;  %1003 = vadd.xlane.f32.xlu0 %v1002_v6  ;;  %v1011_v9 = vsel %vm1001_vm0, %v876_v8, 0.0  ;;  %v709_v11 = vld [vmem:[%s646_s30] sm:$0xff]  ;;  %v871_v15 = vld [vmem:[%s4261_s26 + $0x10] sm:$0xff]  ;;  %v872_v22 = vld [vmem:[%s4261_s26 + $0x18] sm:$0xff]  ;;  %s4063_s26 = smul.u32 288, %s4701_s19 }
  0x13   : > { %v703_v19 = vld [vmem:[%s642_s22] sm:$0xff]  ;;  %s4064_s25 = smul.u32 96, %s4701_s19  ;;  %s697_s22 = scalar_lea.vmem %s4699_s15, %s4701_s19 }
  0x14   : > { %s4316_s16 = scalar_lea.vmem %s4692_s8, %s4063_s26  ;;  %s4065_s30 = smul.u32 3, %s4701_s19 }
  0x15   : > { %v1131_v35 = vld [vmem:[%s4316_s16 + $0x40] sm:$0xff]  ;;  %v1132_v36 = vld [vmem:[%s4316_s16 + $0x48] sm:$0xff]  ;;  %v1133_v41 = vld [vmem:[%s4316_s16 + $0x50] sm:$0xff]  ;;  %s4438_s29 = scalar_lea.vmem %s4693_s9, %s4064_s25  ;;  %s4614_s26 = scalar_lea.vmem %s4696_s12, %s4064_s25 }
  0x16   : > { %1009 = vadd.xlane.f32.xlu1 %v1008_v7  ;;  %v3914_v39 = vpack.c.bf16 %v1132_v36, %v1131_v35  ;;  %v1134_v42 = vld [vmem:[%s4316_s16 + $0x58] sm:$0xff]  ;;  %v1123_v35 = vld [vmem:[%s4316_s16] sm:$0xff]  ;;  %v1124_v36 = vld [vmem:[%s4316_s16 + $0x8] sm:$0xff]  ;;  %s678_s20 = scalar_lea.vmem %s4694_s10, %s4065_s30  ;;  %s4525_s23 = scalar_lea.vmem %s4695_s11, %s4065_s30 }
  0x17   : > { %v3917_v46 = vpack.c.bf16 %v1134_v42, %v1133_v41  ;;  %v4363_v41 = vld [vmem:[%s664_s21] sm:$0xff]  ;;  %s690_s30 = scalar_lea.vmem %s4697_s13, %s4701_s19 }
  0x1a   : > { %1012 = vadd.xlane.f32.xlu1 %v1011_v9 }
  0x28   : > { %922 = vperm.xlu0 %4081, %v869_v10  }
  0x2b   : > { %711 = vperm.xlu1 %4080, %v709_v11  }
  0x2c   : > { %925 = vperm.xlu0 %4081, %v870_v12  }
  0x2f   : > { %881 = vperm.xlu1 %4080, %v870_v12  }
  0x30   : > { %928 = vperm.xlu0 %4081, %v871_v15  }
  0x33   : > { %4082 = vset.pattern.permute.xlu1 %v4153_v0 }
  0x34   : > { %4085 = vset.pattern.permute.xlu0 %v4154_v1  ;;  %938 = vperm.xlu1 %4082, %v873_v3  }
  0x35   : > { %705 = vperm.xlu0 %4085, %v703_v19  }
  0x38   : > { %942 = vperm.xlu1 %4082, %v874_v2  }
  0x39   : > { %878 = vperm.xlu0 %4085, %v869_v10  }
  0x3c   : > { %4083 = vset.pattern.permute.xlu1 %v4158_v21 }
  0x3d   : > { %962 = vperm.xlu1 %4083, %v869_v10   ;;  %895 = vperm.xlu0 %4085, %v873_v3  }
  0x41   : > { %978 = vperm.xlu1 %4083, %v873_v3   ;;  %900 = vperm.xlu0 %4085, %v874_v2  }
  0x45   : > { %4084 = vset.pattern.permute.xlu1 %v4154_v1  ;;  %905 = vperm.xlu0 %4085, %v4255_v4  }
  0x46   : > { %884 = vperm.xlu1 %4084, %v871_v15  }
  0x49   : > { %910 = vperm.xlu0 %4085, %v876_v8  }
  0x4a   : > { %4086 = vset.pattern.permute.xlu1 %v4158_v21 }
  0x4b   : > { %982 = vperm.xlu1 %4086, %v874_v2  }
  0x4d   : > { %4089 = vset.pattern.permute.xlu0 %v4158_v21 }
  0x4e   : > { %965 = vperm.xlu0 %4089, %v870_v12  }
  0x4f   : > { %4087 = vset.pattern.permute.xlu1 %v4154_v1 }
  0x50   : > { %887 = vperm.xlu1 %4087, %v872_v22  }
  0x52   : > { %968 = vperm.xlu0 %4089, %v871_v15  }
  0x54   : > { %4088 = vset.pattern.permute.xlu1 %v4153_v0 }
  0x55   : > { %931 = vperm.xlu1 %4088, %v872_v22  }
  0x56   : > { %990 = vperm.xlu0 %4089, %v876_v8  }
  0x59   : > { %946 = vperm.xlu1 %4088, %v4255_v4  }
  0x5a   : > { %4092 = vset.pattern.permute.xlu0 %v4154_v1 }
  0x5d   : > { %950 = vperm.xlu1 %4088, %v876_v8  }
  0x61   : > { %4090 = vset.pattern.permute.xlu1 %v4158_v21 }
  0x62   : > { %971 = vperm.xlu1 %4090, %v872_v22  }
  0x66   : > { %986 = vperm.xlu1 %4090, %v4255_v4  }
  0x6a   : > { %4091 = vset.pattern.permute.xlu1 %v4154_v1 }
  0x9f   : > { %v1007_v23 = vpop.xlane.xlu1 %1006  ;;  %v1004_v24 = vpop.xlane.xlu0 %1003 }
  0xa0   : > { %v1014_v40 = vmax.f32 %v1004_v24, 1.0  ;;  %v1015_v57 = vmax.f32 %v1007_v23, 1.0 }
  0xa2   : > { %4093 = vrcp.f32 %v1014_v40 }
  0xa3   : > { %v4304_v25 = vpop.xlane.xlu1 %1009  ;;  %4095 = vrcp.f32 %v1015_v57  ;;  %v3387_v57 = vld [vmem:[%s4316_s16 + $0x68] sm:$0xff] }
  0xa4   : > { %v1016_v11 = vmax.f32 %v4304_v25, 1.0 }
  0xa6   : > { %4097 = vrcp.f32 %v1016_v11  ;;  %v1130_v11 = vld [vmem:[%s4316_s16 + $0x38] sm:$0xff] }
  0xa7   : > { %v4306_v27 = vpop.xlane.xlu1 %1012  ;;  %v923_v28 = vpop.permute.xlu0 %922 }
  0xa8   : > { %vm933_vm7 = vcmp.eq.s32.totalorder %v4308_v29, %v923_v28  ;;  %v1017_v12 = vmax.f32 %v4306_v27, 1.0 }
  0xaa   : > { %4099 = vrcp.f32 %v1017_v12 }
  0xab   : > { %v712_v30 = vpop.permute.xlu1 %711  ;;  %v926_v31 = vpop.permute.xlu0 %925 }
  0xac   : > { %vm713_vm3 = vcmp.eq.s32.totalorder %v4308_v29, %v712_v30  ;;  %v4094_v56 = vpop.eup %4093  ;;  %vm934_vm9 = vcmp.eq.s32.totalorder %v4308_v29, %v926_v31 }
  0xad   : > { %v714_v32 = vsel %vm713_vm3, 1.0, %v4155_v13  ;;  %v4096_v7 = vpop.eup %4095  ;;  %vm2156_vm3 = vcmp.gt.s32.totalorder %v4363_v41, 0 }
  0xae   : > { %3621 = vmatmul.mubr.msk.f32.vlgmr.msra.gmra.mrb[0].mxu1 %vm795_vm2, %v714_v32  ;;  %v2157_v42 = vsel %vm2156_vm3, 1, %v4154_v1 }
  0xaf   : > { %v882_v33 = vpop.permute.xlu1 %881  ;;  %v4318_v34 = vpop.permute.xlu0 %928  ;;  %3912 = vmatpush3.bf16.msra.mxu1 %v3907_v20  ;;  %2159 = vperm.xlu1 %4091, %v2157_v42  }
  0xb0   : > { %3919 = vmatprep.subr.bf16.mxu1 %v4157_v16  ;;  %vm890_vm10 = vcmp.eq.s32.totalorder %v4308_v29, %v882_v33  ;;  %vm935_vm14 = vcmp.eq.s32.totalorder %v4308_v29, %v4318_v34  ;;  %v4098_v31 = vpop.eup %4097 }
  0xb3   : > { %v939_v37 = vpop.permute.xlu1 %938 }
  0xb4   : > { %v706_v38 = vpop.permute.xlu0 %705  ;;  %v953_v50 = vsel %vm933_vm7, %v939_v37, 0.0  ;;  %v4100_v32 = vpop.eup %4099  ;;  %v3920_v37 = vpack.c.bf16 %v1124_v36, %v1123_v35  ;;  %vm1161_vm7 = vcmask 261120  }
  0xb5   : > { %vm707_vm5 = vcmp.eq.s32.totalorder %v4308_v29, %v706_v38  ;;  %v1125_v38 = vld [vmem:[%s4316_s16 + $0x10] sm:$0xff] }
  0xb6   : > { %v708_v43 = vsel %vm707_vm5, 1.0, %v4155_v13  ;;  %vm2644_vm5 = vcmp.gt.s32.totalorder %v4363_v41, 2 }
  0xb7   : > { %v943_v44 = vpop.permute.xlu1 %942  ;;  %3616 = vmatmul.mubr.msk.f32.vlgmr.msra.gmra.mrb[0].mxu0 %vm721_vm4, %v708_v43  ;;  %v2645_v43 = vsel %vm2644_vm5, 1, %v4154_v1 }
  0xb8   : > { %v879_v45 = vpop.permute.xlu0 %878  ;;  %3915 = vmatpush3.bf16.msra.mxu0 %v3914_v39  ;;  %3641 = vmatprep.mubr.msk.f32.mxu0 %vm4156_vm1, %v4155_v13  ;;  %v954_v0 = vsel %vm934_vm9, %v943_v44, 0.0  ;;  %v1126_v39 = vld [vmem:[%s4316_s16 + $0x18] sm:$0xff] }
  0xb9   : > { %3916 = vmatprep.subr.bf16.mxu0 %v4157_v16  ;;  %vm889_vm6 = vcmp.eq.s32.totalorder %v4308_v29, %v879_v45  ;;  %v3923_v40 = vpack.c.bf16 %v1126_v39, %v1125_v38  ;;  %2647 = vperm.xlu1 %4091, %v2645_v43   ;;  %v715_v45 = vld [vmem:[%s650_s24] sm:$0xff]  ;;  %v1884_v38 = vld [vmem:[%s4438_s29 + $0x18] sm:$0xff] }
  0xba   : > { %v3433_v43 = vld [vmem:[%s4438_s29 + $0x20] sm:$0xff] }
  0xbc   : > { %v963_v47 = vpop.permute.xlu1 %962  ;;  %v896_v48 = vpop.permute.xlu0 %895  ;;  %3918 = vmatpush3.bf16.msra.mxu0 %v3917_v46  ;;  %v3394_v46 = vld [vmem:[%s4316_s16 + $0xa0] sm:$0xff] }
  0xbd   : > { %v913_v49 = vsel %vm889_vm6, %v896_v48, 0.0  ;;  %3925 = vmatprep.subr.bf16.mxu0 %v4157_v16  ;;  %vm973_vm8 = vcmp.eq.s32.totalorder %v4308_v29, %v963_v47  ;;  %vm2888_vm6 = vcmp.gt.s32.totalorder %v4363_v41, 3  ;;  %v3395_v47 = vld [vmem:[%s4316_s16 + $0xa8] sm:$0xff] }
  0xbe   : > { %v957_v51 = vadd.f32 %v953_v50, %v913_v49  ;;  %v2889_v44 = vsel %vm2888_vm6, 1, %v4154_v1  ;;  %v3926_v48 = vpack.c.bf16 %v3395_v47, %v3394_v46  ;;  %v3396_v49 = vld [vmem:[%s4316_s16 + $0xb0] sm:$0xff]  ;;  %v3397_v50 = vld [vmem:[%s4316_s16 + $0xb8] sm:$0xff]  ;;  %v3438_v46 = vld [vmem:[%s4438_s29 + $0x48] sm:$0xff] }
  0xbf   : > { %2891 = vperm.xlu1 %4091, %v2889_v44   ;;  %v3434_v44 = vld [vmem:[%s4438_s29 + $0x28] sm:$0xff] }
  0xc0   : > { %v979_v52 = vpop.permute.xlu1 %978  ;;  %v901_v53 = vpop.permute.xlu0 %900  ;;  %v4470_v47 = vpack.c.bf16 %v3434_v44, %v3433_v43 }
  0xc1   : > { %v993_v54 = vsel %vm973_vm8, %v979_v52, 0.0  ;;  %v914_v63 = vsel %vm890_vm10, %v901_v53, 0.0  ;;  %v3929_v53 = vpack.c.bf16 %v3397_v50, %v3396_v49  ;;  %v3436_v49 = vld [vmem:[%s4438_s29 + $0x38] sm:$0xff]  ;;  %vm2400_vm8 = vcmp.gt.s32.totalorder %v4363_v41, 1  ;;  %v3416_v41 = vld [vmem:[%s678_s20 + $0x1] ss:$0 sm:$0xff] }
  0xc2   : > { %v997_v55 = vadd.f32 %v993_v54, %v957_v51  ;;  %v958_v3 = vadd.f32 %v954_v0, %v914_v63  ;;  %v3406_v54 = vld [vmem:[%s4316_s16 + $0x100] sm:$0xff]  ;;  %v3389_v63 = vld [vmem:[%s4316_s16 + $0x78] sm:$0xff] }
  0xc3   : > { %717 = vperm.xlu1 %4091, %v715_v45   ;;  %v1127_v0 = vld [vmem:[%s4316_s16 + $0x20] sm:$0xff] }
  0xc4   : > { %v1019_v58 = vmul.f32 %v4094_v56, %v997_v55  ;;  %v906_v59 = vpop.permute.xlu0 %905  ;;  %v3407_v55 = vld [vmem:[%s4316_s16 + $0x108] sm:$0xff]  ;;  %v3386_v56 = vld [vmem:[%s4316_s16 + $0x60] sm:$0xff] }
  0xc5   : > { %v885_v60 = vpop.permute.xlu1 %884  ;;  %v3437_v45 = vld [vmem:[%s4438_s29 + $0x40] sm:$0xff] }
  0xc6   : > { %3627 = vmatprep.mubr.msk.f32.mxu1 %vm721_vm4, %v1019_v58  ;;  %vm891_vm15 = vcmp.eq.s32.totalorder %v4308_v29, %v885_v60  ;;  %v3938_v58 = vpack.c.bf16 %v3407_v55, %v3406_v54  ;;  %v3408_v60 = vld [vmem:[%s4316_s16 + $0x110] sm:$0xff]  ;;  %v4474_v50 = vpack.c.bf16 %v3438_v46, %v3437_v45 }
  0xc7   : > { %v915_v23 = vsel %vm891_vm15, %v906_v59, 0.0  ;;  %v3932_v59 = vpack.c.bf16 %v3387_v57, %v3386_v56  ;;  %v2401_v57 = vsel %vm2400_vm8, 1, %v4154_v1  ;;  %v3412_v1 = vld [vmem:[%s678_s20] ss:$0 sm:$0xff] }
  0xc8   : > { %v911_v61 = vpop.permute.xlu0 %910  ;;  %2403 = vperm.xlu0 %4092, %v2401_v57  }
  0xca   : > { %v983_v62 = vpop.permute.xlu1 %982 }
  0xcd   : > { %v966_v2 = vpop.permute.xlu0 %965 }
  0xce   : > { %vm974_vm11 = vcmp.eq.s32.totalorder %v4308_v29, %v966_v2  ;;  %v1128_v2 = vld [vmem:[%s4316_s16 + $0x28] sm:$0xff] }
  0xcf   : > { %v994_v4 = vsel %vm974_vm11, %v983_v62, 0.0  ;;  %v888_v5 = vpop.permute.xlu1 %887  ;;  %v3388_v62 = vld [vmem:[%s4316_s16 + $0x70] sm:$0xff] }
  0xd0   : > { %v998_v6 = vadd.f32 %v994_v4, %v958_v3  ;;  %vm892_vm12 = vcmp.eq.s32.totalorder %v4308_v29, %v888_v5 }
  0xd1   : > { %v969_v14 = vpop.permute.xlu0 %968  ;;  %v916_v21 = vsel %vm892_vm12, %v911_v61, 0.0  ;;  %v3409_v61 = vld [vmem:[%s4316_s16 + $0x118] sm:$0xff] }
  0xd2   : > { %v1021_v8 = vmul.f32 %v4096_v7, %v998_v6  ;;  %vm975_vm2 = vcmp.eq.s32.totalorder %v4308_v29, %v969_v14  ;;  %v3941_v4 = vpack.c.bf16 %v3409_v61, %v3408_v60  ;;  %v3935_v6 = vpack.c.bf16 %v3389_v63, %v3388_v62  ;;  %v3400_v14 = vld [vmem:[%s4316_s16 + $0xd0] sm:$0xff] }
  0xd3   : > { %v3949_v7 = vpack.c.bf16 %v1128_v2, %v1127_v0 }
  0xd4   : > { %v932_v9 = vpop.permute.xlu1 %931  ;;  %3628 = vmatmul.mubr.msk.f32.vlgmr.msra.gmra.mrb[2].mxu1 %vm721_vm4, %v1021_v8  ;;  %v3398_v8 = vld [vmem:[%s4316_s16 + $0xc0] sm:$0xff] }
  0xd5   : > { %vm936_vm13 = vcmp.eq.s32.totalorder %v4308_v29, %v932_v9  ;;  %v991_v20 = vpop.permute.xlu0 %990  ;;  %3921 = vmatpush3.bf16.msra.mxu1 %v3920_v37  ;;  %v3399_v9 = vld [vmem:[%s4316_s16 + $0xc8] sm:$0xff]  ;;  %v1883_v37 = vld [vmem:[%s4438_s29 + $0x10] sm:$0xff] }
  0xd6   : > { %3922 = vmatprep.subr.bf16.mxu1 %v4157_v16  ;;  %v3944_v12 = vpack.c.bf16 %v3399_v9, %v3398_v8  ;;  %v4453_v39 = vpack.c.bf16 %v1884_v38, %v1883_v37 }
  0xd8   : > { %v947_v10 = vpop.permute.xlu1 %946 }
  0xd9   : > { %v955_v19 = vsel %vm935_vm14, %v947_v10, 0.0  ;;  %3924 = vmatpush3.bf16.msra.mxu1 %v3923_v40  ;;  %v1129_v10 = vld [vmem:[%s4316_s16 + $0x30] sm:$0xff] }
  0xda   : > { %v959_v25 = vadd.f32 %v955_v19, %v915_v23  ;;  %3931 = vmatprep.subr.bf16.mxu1 %v4157_v16  ;;  %v3403_v19 = vld [vmem:[%s4316_s16 + $0xe8] sm:$0xff] }
  0xdc   : > { %v951_v15 = vpop.permute.xlu1 %950 }
  0xdd   : > { %v956_v17 = vsel %vm936_vm13, %v951_v15, 0.0  ;;  %v3401_v15 = vld [vmem:[%s4316_s16 + $0xd8] sm:$0xff] }
  0xde   : > { %v960_v24 = vadd.f32 %v956_v17, %v916_v21  ;;  %v3953_v17 = vpack.c.bf16 %v1130_v11, %v1129_v10  ;;  %v3391_v21 = vld [vmem:[%s4316_s16 + $0x88] sm:$0xff] }
  0xe1   : > { %v972_v18 = vpop.permute.xlu1 %971 }
  0xe2   : > { %vm976_vm0 = vcmp.eq.s32.totalorder %v4308_v29, %v972_v18  ;;  %v3402_v18 = vld [vmem:[%s4316_s16 + $0xe0] sm:$0xff] }
  0xe3   : > { %v996_v22 = vsel %vm976_vm0, %v991_v20, 0.0  ;;  %v3390_v20 = vld [vmem:[%s4316_s16 + $0x80] sm:$0xff]  ;;  %v3965_v23 = vpack.c.bf16 %v3403_v19, %v3402_v18 }
  0xe4   : > { %v1000_v27 = vadd.f32 %v996_v22, %v960_v24  ;;  %v3947_v22 = vpack.c.bf16 %v3401_v15, %v3400_v14  ;;  %v3957_v24 = vpack.c.bf16 %v3391_v21, %v3390_v20 }
  0xe5   : > { %v987_v26 = vpop.permute.xlu1 %986 }
  0xe6   : > { %v995_v28 = vsel %vm975_vm2, %v987_v26, 0.0  ;;  %v1025_v34 = vmul.f32 %v4100_v32, %v1000_v27  ;;  %v3393_v26 = vld [vmem:[%s4316_s16 + $0x98] sm:$0xff] }
  0xe7   : > { %v999_v30 = vadd.f32 %v995_v28, %v959_v25  ;;  %v3392_v25 = vld [vmem:[%s4316_s16 + $0x90] sm:$0xff]  ;;  %v1881_v28 = vld [vmem:[%s4438_s29] sm:$0xff]  ;;  %v3405_v32 = vld [vmem:[%s4316_s16 + $0xf8] sm:$0xff] }
  0xe8   : > { %v3961_v27 = vpack.c.bf16 %v3393_v26, %v3392_v25 }
  0xe9   : > { %v1023_v33 = vmul.f32 %v4098_v31, %v999_v30  ;;  %v1882_v30 = vld [vmem:[%s4438_s29 + $0x8] sm:$0xff]  ;;  %v3404_v31 = vld [vmem:[%s4316_s16 + $0xf0] sm:$0xff] }
  0xea   : > { %v3969_v36 = vpack.c.bf16 %v3405_v32, %v3404_v31  ;;  %v4536_v32 = vld [vmem:[%s4525_s23] ss:$0 sm:$0xff] }
  0xeb   : > { %3630 = vmatprep.mubr.msk.f32.mxu1 %vm721_vm4, %v1023_v33 }
  0xec   : > { %3631 = vmatmul.mubr.msk.f32.gmra.mrb[4].mxu1 %vm721_vm4, %v1025_v34  ;;  %v4444_v34 = vpack.c.bf16 %v1882_v30, %v1881_v28 }
  0xed   : > { %3652 = vmatprep.mubr.msk.f32.mxu1 %vm4156_vm1, %v4155_v13 }
 0x181   : > { %v4379_v51 = vpop.f32.mrb[0].mxu1 }
 0x182   : > { %v3622_v52 = vpop.f32.mrb[1].mxu1  ;;  %3642 = vmatmul.mubr.msk.f32.vlgmr.msra.gmra.mrb[2].mxu0 %vm1161_vm7, %v4379_v51 }
 0x183   : > { %3927 = vmatpush3.bf16.msra.mxu0 %v3926_v48  ;;  %3663 = vmatprep.mubr.msk.f32.mxu0 %vm4156_vm1, %v4155_v13  ;;  %v3435_v48 = vld [vmem:[%s4438_s29 + $0x30] sm:$0xff] }
 0x184   : > { %3928 = vmatprep.subr.bf16.mxu0 %v4157_v16  ;;  %v3439_v52 = vld [vmem:[%s4438_s29 + $0x50] sm:$0xff]  ;;  %v4482_v54 = vpack.c.bf16 %v3436_v49, %v3435_v48 }
 0x187   : > { %3930 = vmatpush3.bf16.msra.mxu0 %v3929_v53  ;;  %v3440_v53 = vld [vmem:[%s4438_s29 + $0x58] sm:$0xff] }
 0x188   : > { %3937 = vmatprep.subr.bf16.mxu0 %v4157_v16  ;;  %v4486_v55 = vpack.c.bf16 %v3440_v53, %v3439_v52  ;;  %v4546_v53 = vld [vmem:[%s4525_s23 + $0x1] ss:$0 sm:$0xff] }
 0x18a   : > { %3664 = vmatmul.mubr.msk.f32.vlgmr.msra.gmra.mrb[4].mxu0 %vm1161_vm7, %v4379_v51  ;;  %v4399_v3 = vpop.f32.mrb[0].mxu0 }
 0x18b   : > { %3939 = vmatpush3.bf16.msra.mxu0 %v3938_v58  ;;  %3653 = vmatmul.mubr.msk.f32.vlgmr.msra.gmra.mrb[6].mxu1 %vm1161_vm7, %v4399_v3  ;;  %v3617_v5 = vpop.f32.mrb[1].mxu0 }
 0x18c   : > { %3933 = vmatpush3.bf16.msra.mxu1 %v3932_v59  ;;  %3940 = vmatprep.subr.bf16.mxu0 %v4157_v16 }
 0x18d   : > { %3934 = vmatprep.subr.bf16.mxu1 %v4157_v16  ;;  %3685 = vmatprep.mubr.msk.f32.mxu0 %vm4156_vm1, %v4155_v13 }
 0x18e   : > { %3674 = vmatprep.mubr.msk.f32.mxu1 %vm4156_vm1, %v4155_v13 }
 0x18f   : > { %3942 = vmatpush3.bf16.msra.mxu0 %v3941_v4 }
 0x190   : > { %3936 = vmatpush3.bf16.msra.mxu1 %v3935_v6  ;;  %3950 = vmatprep.subr.bf16.mxu0 %v3949_v7 }
 0x191   : > { %3943 = vmatprep.subr.bf16.mxu1 %v4157_v16 }
 0x192   : > { %3686 = vmatmul.mubr.msk.f32.vlgmr.msra.gmra.mrb[6].mxu0 %vm1161_vm7, %v4379_v51 }
 0x193   : > { %3675 = vmatmul.mubr.msk.f32.vlgmr.msra.gmra.mrb[8].mxu1 %vm1161_vm7, %v4399_v3  ;;  %3952 = vmatpush3.bf16.msra.mxu0 %v3949_v7 }
 0x194   : > { %3945 = vmatpush3.bf16.msra.mxu1 %v3944_v12  ;;  %3696 = vmatprep.mubr.msk.f32.mxu1 %vm4156_vm1, %v4155_v13 }
 0x195   : > { %3946 = vmatprep.subr.bf16.mxu1 %v4157_v16  ;;  %3954 = vmatprep.subr.bf16.mxu0 %v3953_v17 }
 0x197   : > { %3956 = vmatpush3.bf16.msra.mxu0 %v3953_v17 }
 0x198   : > { %3948 = vmatpush3.bf16.msra.mxu1 %v3947_v22  ;;  %3966 = vmatprep.subr.bf16.mxu0 %v3965_v23  ;;  %v3420_v22 = vld [vmem:[%s678_s20 + $0x2] ss:$0 sm:$0xff]  ;;  %s694_s20 = scalar_lea.vmem %s4698_s14, %s4264_s27 }
 0x199   : > { %3958 = vmatprep.subr.bf16.mxu1 %v3957_v24 }
 0x19b   : > { %3697 = vmatmul.mubr.msk.f32.vlgmr.msra.gmra.mrb[10].mxu1 %vm1161_vm7, %v4399_v3 }
 0x19c   : > { %3960 = vmatpush3.bf16.msra.mxu1 %v3957_v24 }
 0x19d   : > { %3962 = vmatprep.subr.bf16.mxu1 %v3961_v27 }
 0x1a0   : > { %3964 = vmatpush3.bf16.msra.mxu1 %v3961_v27 }
 0x1a1   : > { %3973 = vmatprep.subr.bf16.mxu1 %v4157_v16 }
 0x1a7   : > { %v3629_v33 = vpop.f32.mrb[2].mxu1 }
 0x1a8   : > { %v1104_v35 = vpop.f32.mrb[3].mxu1 }
 0x1a9   : > { %3707 = vmatprep.mubr.msk.f32.mxu0 %vm1161_vm7, %v1104_v35  ;;  %3721 = vmatprep.mubr.msk.f32.mxu1 %vm1161_vm7, %v1104_v35 }
 0x1aa   : > { %3708 = vmatmul.mubr.msk.f32.vlgmr.msra.gmra.mrb[8].mxu0 %vm1161_vm7, %v3629_v33  ;;  %3722 = vmatmul.mubr.msk.f32.vlgmr.msra.gmra.mrb[12].mxu1 %vm1161_vm7, %v3629_v33 }
 0x1ab   : > { %3975 = vmatpush3.bf16.msra.mxu1 %v4444_v34  ;;  %3968 = vmatpush3.bf16.msra.mxu0 %v3965_v23 }
 0x1ac   : > { %3976 = vmatprep.subr.bf16.mxu1 %v4157_v16  ;;  %3970 = vmatprep.subr.bf16.mxu0 %v3969_v36 }
 0x1af   : > { %3978 = vmatpush3.bf16.msra.mxu1 %v4453_v39  ;;  %3972 = vmatpush3.bf16.msra.mxu0 %v3969_v36 }
 0x1b0   : > { %3979 = vmatprep.subr.bf16.mxu0 %v4157_v16  ;;  %3985 = vmatprep.subr.bf16.mxu1 %v4157_v16 }
 0x1bf   : > { %v3632_v40 = vpop.f32.mrb[4].mxu1 }
 0x1c0   : > { %v1114_v42 = vpop.f32.mrb[5].mxu1 }
 0x1c1   : > { %3710 = vmatprep.mubr.msk.f32.mxu0 %vm1161_vm7, %v1114_v42  ;;  %3724 = vmatprep.mubr.msk.f32.mxu1 %vm1161_vm7, %v1114_v42 }
 0x1c2   : > { %3711 = vmatmul.mubr.msk.f32.gmra.mrb[10].mxu0 %vm1161_vm7, %v3632_v40  ;;  %3725 = vmatmul.mubr.msk.f32.gmra.mrb[14].mxu1 %vm1161_vm7, %v3632_v40 }
 0x1c3   : > { %3735 = vmatprep.mubr.msk.f32.mxu0 %vm1161_vm7, %v1104_v35  ;;  %3749 = vmatprep.mubr.msk.f32.mxu1 %vm4156_vm1, %v4155_v13 }
 0x1c6   : > { %3736 = vmatmul.mubr.msk.f32.vlgmr.msra.gmra.mrb[12].mxu0 %vm1161_vm7, %v3629_v33  ;;  %3750 = vmatmul.mubr.f32.vlgmr.msra.gmra.mrb[16].mxu1 %v4155_v13 }
 0x1c7   : > { %3738 = vmatprep.mubr.msk.f32.mxu0 %vm1161_vm7, %v1114_v42  ;;  %3981 = vmatpush3.bf16.msra.mxu0 %v4470_v47 }
 0x1c8   : > { %3982 = vmatprep.subr.bf16.mxu0 %v4157_v16  ;;  %3987 = vmatpush3.bf16.msra.mxu1 %v4474_v50 }
 0x1c9   : > { %3988 = vmatprep.subr.bf16.mxu1 %v4157_v16  ;;  %3771 = vmatprep.mubr.msk.f32.mxu1 %vm4156_vm1, %v4155_v13 }
 0x1ca   : > { %3739 = vmatmul.mubr.msk.f32.gmra.mrb[14].mxu0 %vm1161_vm7, %v3632_v40 }
 0x1cb   : > { %3984 = vmatpush3.bf16.msra.mxu0 %v4482_v54  ;;  %3760 = vmatprep.mubr.msk.f32.mxu0 %vm4156_vm1, %v4155_v13 }
 0x1cc   : > { %3990 = vmatpush3.bf16.msra.mxu1 %v4486_v55  ;;  %3991 = vmatprep.subr.bf16.mxu0 %v4157_v16 }
 0x1cd   : > { %3997 = vmatprep.subr.bf16.mxu1 %v4157_v16 }
 0x1ce   : > { %3761 = vmatmul.mubr.f32.vlgmr.msra.gmra.mrb[16].mxu0 %v4155_v13 }
 0x1cf   : > { %3772 = vmatmul.mubr.f32.vlgmr.msra.gmra.mrb[18].mxu1 %v4155_v13  ;;  %3993 = vmatpush3.bf16.msra.mxu0 %v4444_v34 }
 0x1d0   : > { %3999 = vmatpush3.bf16.msra.mxu1 %v4470_v47  ;;  %3994 = vmatprep.subr.bf16.mxu0 %v4157_v16 }
 0x1d1   : > { %4000 = vmatprep.subr.bf16.mxu1 %v4157_v16  ;;  %3782 = vmatprep.mubr.msk.f32.mxu0 %vm4156_vm1, %v4155_v13 }
 0x1d2   : > { %3793 = vmatprep.mubr.msk.f32.mxu1 %vm4156_vm1, %v4155_v13 }
 0x1d3   : > { %3996 = vmatpush3.bf16.msra.mxu0 %v4453_v39 }
 0x1d4   : > { %4002 = vmatpush3.bf16.msra.mxu1 %v4482_v54  ;;  %4003 = vmatprep.subr.bf16.mxu0 %v4157_v16 }
 0x1d5   : > { %4009 = vmatprep.subr.bf16.mxu1 %v4157_v16 }
 0x255   : > { %v1231_v56 = vpop.f32.mrb[2].mxu0 }
 0x256   : > { %v3643_v58 = vpop.f32.mrb[3].mxu0 }
 0x25d   : > { %v1382_v59 = vpop.f32.mrb[4].mxu0 }
 0x25e   : > { %v3665_v60 = vpop.f32.mrb[5].mxu0  ;;  %v1304_v61 = vpop.f32.mrb[6].mxu1 }
 0x25f   : > { %v1305_v62 = vadd.f32 %v1304_v61, %v1231_v56  ;;  %v3654_v63 = vpop.f32.mrb[7].mxu1 }
 0x261   : > { %v1315_v10 = vadd.f32 %v3412_v1, %v1305_v62 }
 0x265   : > { %v1531_v0 = vpop.f32.mrb[6].mxu0 }
 0x266   : > { %v1452_v2 = vpop.f32.mrb[8].mxu1  ;;  %v3687_v4 = vpop.f32.mrb[7].mxu0 }
 0x267   : > { %v1453_v5 = vadd.f32 %v1452_v2, %v1382_v59  ;;  %v3676_v6 = vpop.f32.mrb[9].mxu1  ;;  %v4550_v2 = vld [vmem:[%s4525_s23 + $0x2] ss:$0 sm:$0xff] }
 0x269   : > { %v1464_v11 = vadd.f32 %v3416_v41, %v1453_v5 }
 0x26e   : > { %v1601_v7 = vpop.f32.mrb[10].mxu1 }
 0x26f   : > { %v1602_v8 = vadd.f32 %v1601_v7, %v1531_v0  ;;  %v3698_v9 = vpop.f32.mrb[11].mxu1 }
 0x271   : > { %v1613_v33 = vadd.f32 %v3420_v22, %v1602_v8 }
 0x27d   : > { %v3709_v12 = vpop.f32.mrb[8].mxu0  ;;  %v3723_v14 = vpop.f32.mrb[12].mxu1 }
 0x27e   : > { %v4518_v15 = vadd.f32 %v3709_v12, %v1315_v10  ;;  %v4520_v17 = vadd.f32 %v3723_v14, %v1464_v11  ;;  %v1692_v18 = vpop.f32.mrb[9].mxu0  ;;  %v1777_v19 = vpop.f32.mrb[13].mxu1 }
 0x27f   : > { %v2132_v20 = vadd.f32 %v1692_v18, %v1315_v10  ;;  %v2140_v21 = vadd.f32 %v1777_v19, %v1464_v11 }
 0x295   : > { %v3712_v23 = vpop.f32.mrb[10].mxu0  ;;  %v3726_v24 = vpop.f32.mrb[14].mxu1 }
 0x296   : > { %v4527_v25 = vadd.f32 %v3712_v23, %v1315_v10  ;;  %v4529_v26 = vadd.f32 %v3726_v24, %v1464_v11  ;;  %v1702_v27 = vpop.f32.mrb[11].mxu0  ;;  %v1787_v28 = vpop.f32.mrb[15].mxu1 }
 0x297   : > { %v4531_v30 = vadd.f32 %v1702_v27, %v1315_v10  ;;  %v4533_v31 = vadd.f32 %v1787_v28, %v1464_v11  ;;  %v2160_v11 = vpop.permute.xlu1 %2159 }
 0x298   : > { %vm2161_vm9 = vcmp.eq.s32.totalorder %v2160_v11, 1 }
 0x299   : > { %v3737_v35 = vpop.f32.mrb[12].mxu0  ;;  %v1976_v36 = vpop.f32.mrb[16].mxu1 }
 0x29a   : > { %v4538_v37 = vadd.f32 %v3737_v35, %v1613_v33  ;;  %v1977_v38 = vadd.f32 %v4536_v32, %v1976_v36  ;;  %v1862_v40 = vpop.f32.mrb[13].mxu0  ;;  %v3751_v42 = vpop.f32.mrb[17].mxu1 }
 0x29b   : > { %v2148_v43 = vadd.f32 %v1862_v40, %v1613_v33 }
 0x29c   : > { %v2133_v44 = vadd.f32 %v2132_v20, %v1977_v38 }
 0x29d   : > { %v3740_v45 = vpop.f32.mrb[14].mxu0 }
 0x29e   : > { %v3446_v46 = vmul.f32 -1.442695, %v2133_v44  ;;  %v4541_v48 = vadd.f32 %v3740_v45, %v1613_v33  ;;  %v1872_v49 = vpop.f32.mrb[15].mxu0 }
 0x29f   : > { %v4543_v52 = vadd.f32 %v1872_v49, %v1613_v33 }
 0x2a0   : > { %4101 = vpow2.f32 %v3446_v46 }
 0x2a1   : > { %v2052_v56 = vpop.f32.mrb[16].mxu0 }
 0x2a2   : > { %v2053_v57 = vadd.f32 %v4546_v53, %v2052_v56  ;;  %v3762_v58 = vpop.f32.mrb[17].mxu0  ;;  %v2128_v59 = vpop.f32.mrb[18].mxu1 }
 0x2a3   : > { %v3773_v60 = vpop.f32.mrb[19].mxu1  ;;  %v2129_v6 = vadd.f32 %v4550_v2, %v2128_v59  ;;  %v2404_v58 = vpop.permute.xlu0 %2403 }
 0x2a4   : > { %v2141_v61 = vadd.f32 %v2140_v21, %v2053_v57  ;;  %vm2405_vm10 = vcmp.eq.s32.totalorder %v2404_v58, 1 }
 0x2a6   : > { %v3447_v62 = vmul.f32 -1.442695, %v2141_v61 }
 0x2a8   : > { %4103 = vpow2.f32 %v3447_v62 }
 0x2aa   : > { %v4102_v63 = vpop.eup %4101 }
 0x2ab   : > { %v2137_v0 = vadd.f32 1.0, %v4102_v63 }
 0x2ad   : > { %4105 = vrcp.f32 %v2137_v0 }
 0x2b2   : > { %v4104_v4 = vpop.eup %4103 }
 0x2b3   : > { %v2145_v5 = vadd.f32 1.0, %v4104_v4 }
 0x2b5   : > { %4107 = vrcp.f32 %v2145_v5 }
 0x2b7   : > { %v4106_v7 = vpop.eup %4105 }
 0x2b8   : > { %v2149_v8 = vmul.f32 %v4106_v7, %v2129_v6 }
 0x2ba   : > { %v2150_v9 = vadd.f32 %v2149_v8, %v2148_v43 }
 0x2bc   : > { %4109 = vtanh.f32 %v2150_v9 }
 0x2bf   : > { %v4108_v1 = vpop.eup %4107 }
 0x2c0   : > { %v2152_v41 = vsub.f32 1.0, %v4108_v1  ;;  %v2154_v14 = vmul.f32 0.0, %v4108_v1 }
 0x2c6   : > { %v4110_v10 = vpop.eup %4109 }
 0x2c7   : > { %v2153_v12 = vmul.f32 %v4110_v10, %v2152_v41 }
 0x2c9   : > { %v2155_v18 = vadd.f32 %v2154_v14, %v2153_v12 }
 0x2cb   : > { %v2162_v19 = vsel %vm2161_vm9, %v2155_v18, 0.0 }
 0x2cc   : > { %3783 = vmatmul.mubr.msk.f32.vlgmr.msra.gmra.mrb[18].mxu0 %vm1161_vm7, %v2162_v19  ;;  %3794 = vmatmul.mubr.msk.f32.vlgmr.msra.gmra.mrb[20].mxu1 %vm1161_vm7, %v2162_v19 }
 0x2cd   : > { %4005 = vmatpush3.bf16.msra.mxu0 %v4474_v50  ;;  %3804 = vmatprep.mubr.msk.f32.mxu0 %vm4156_vm1, %v4155_v13 }
 0x2ce   : > { %4006 = vmatprep.subr.bf16.mxu0 %v4157_v16  ;;  %4011 = vmatpush3.bf16.msra.mxu1 %v4444_v34 }
 0x2cf   : > { %4012 = vmatprep.subr.bf16.mxu1 %v4157_v16  ;;  %3815 = vmatprep.mubr.msk.f32.mxu1 %vm4156_vm1, %v4155_v13 }
 0x2d1   : > { %4008 = vmatpush3.bf16.msra.mxu0 %v4486_v55 }
 0x2d2   : > { %4015 = vmatprep.subr.bf16.mxu0 %v4157_v16  ;;  %4014 = vmatpush3.bf16.msra.mxu1 %v4453_v39 }
 0x2d3   : > { %4021 = vmatprep.subr.bf16.mxu1 %v4157_v16 }
 0x2d4   : > { %3805 = vmatmul.mubr.msk.f32.vlgmr.msra.gmra.mrb[20].mxu0 %vm1161_vm7, %v2162_v19 }
 0x2d5   : > { %4017 = vmatpush3.bf16.msra.mxu0 %v4470_v47  ;;  %3826 = vmatprep.mubr.msk.f32.mxu0 %vm4156_vm1, %v4155_v13 }
 0x2d6   : > { %4018 = vmatprep.subr.bf16.mxu0 %v4157_v16 }
 0x2d9   : > { %4020 = vmatpush3.bf16.msra.mxu0 %v4482_v54 }
 0x2da   : > { %4027 = vmatprep.subr.bf16.mxu0 %v4157_v16 }
 0x39f   : > { %v2232_v20 = vpop.f32.mrb[18].mxu0  ;;  %v2302_v21 = vpop.f32.mrb[20].mxu1 }
 0x3a0   : > { %v2233_v22 = vadd.f32 %v4536_v32, %v2232_v20  ;;  %v2303_v23 = vadd.f32 %v4546_v53, %v2302_v21  ;;  %v3784_v24 = vpop.f32.mrb[19].mxu0  ;;  %v3795_v27 = vpop.f32.mrb[21].mxu1 }
 0x3a2   : > { %v2377_v28 = vadd.f32 %v4518_v15, %v2233_v22  ;;  %v2385_v33 = vadd.f32 %v4520_v17, %v2303_v23  ;;  %v2648_v23 = vpop.permute.xlu1 %2647 }
 0x3a3   : > { %vm2649_vm11 = vcmp.eq.s32.totalorder %v2648_v23, 1 }
 0x3a4   : > { %v3451_v35 = vmul.f32 -1.442695, %v2377_v28  ;;  %v3452_v40 = vmul.f32 -1.442695, %v2385_v33  ;;  %v2896_v28 = vld [vmem:[%s4614_s26 + $0x8] sm:$0xff] }
 0x3a6   : > { %4111 = vpow2.f32 %v3451_v35  ;;  %v2898_v35 = vld [vmem:[%s4614_s26 + $0x18] sm:$0xff] }
 0x3a7   : > { %v2372_v36 = vpop.f32.mrb[20].mxu0  ;;  %4113 = vpow2.f32 %v3452_v40  ;;  %v2901_v40 = vld [vmem:[%s4614_s26 + $0x30] sm:$0xff] }
 0x3a8   : > { %v3806_v38 = vpop.f32.mrb[21].mxu0  ;;  %v2373_v46 = vadd.f32 %v4550_v2, %v2372_v36 }
 0x3a9   : > { %v2900_v38 = vld [vmem:[%s4614_s26 + $0x28] sm:$0xff] }
 0x3b0   : > { %v4112_v42 = vpop.eup %4111 }
 0x3b1   : > { %v2381_v43 = vadd.f32 1.0, %v4112_v42  ;;  %v4114_v44 = vpop.eup %4113 }
 0x3b2   : > { %v2389_v45 = vadd.f32 1.0, %v4114_v44 }
 0x3b3   : > { %4115 = vrcp.f32 %v2381_v43  ;;  %v2902_v43 = vld [vmem:[%s4614_s26 + $0x38] sm:$0xff] }
 0x3b4   : > { %4117 = vrcp.f32 %v2389_v45  ;;  %v4049_v44 = vpack.c.bf16 %v2902_v43, %v2901_v40 }
 0x3bd   : > { %v4116_v49 = vpop.eup %4115 }
 0x3be   : > { %v2393_v56 = vmul.f32 %v4116_v49, %v2373_v46  ;;  %v4118_v17 = vpop.eup %4117 }
 0x3bf   : > { %v2396_v57 = vsub.f32 1.0, %v4118_v17  ;;  %v2398_v61 = vmul.f32 %v4118_v17, %v2162_v19 }
 0x3c0   : > { %v2394_v15 = vadd.f32 %v2393_v56, %v4538_v37 }
 0x3c2   : > { %4119 = vtanh.f32 %v2394_v15 }
 0x3cc   : > { %v4120_v59 = vpop.eup %4119 }
 0x3cd   : > { %v2397_v60 = vmul.f32 %v4120_v59, %v2396_v57 }
 0x3cf   : > { %v2399_v62 = vadd.f32 %v2398_v61, %v2397_v60 }
 0x3d1   : > { %v2406_v63 = vsel %vm2405_vm10, %v2399_v62, %v2162_v19 }
 0x3d2   : > { %3816 = vmatmul.mubr.msk.f32.vlgmr.msra.gmra.mrb[22].mxu1 %vm1161_vm7, %v2406_v63  ;;  %3827 = vmatmul.mubr.msk.f32.vlgmr.msra.gmra.mrb[22].mxu0 %vm1161_vm7, %v2406_v63 }
 0x3d3   : > { %4023 = vmatpush3.bf16.msra.mxu1 %v4474_v50  ;;  %3837 = vmatprep.mubr.msk.f32.mxu1 %vm4156_vm1, %v4155_v13 }
 0x3d4   : > { %4024 = vmatprep.subr.bf16.mxu1 %v4157_v16  ;;  %4029 = vmatpush3.bf16.msra.mxu0 %v4444_v34 }
 0x3d5   : > { %4030 = vmatprep.subr.bf16.mxu0 %v4157_v16  ;;  %3848 = vmatprep.mubr.msk.f32.mxu0 %vm4156_vm1, %v4155_v13 }
 0x3d7   : > { %4026 = vmatpush3.bf16.msra.mxu1 %v4486_v55 }
 0x3d8   : > { %4033 = vmatprep.subr.bf16.mxu1 %v4157_v16  ;;  %4032 = vmatpush3.bf16.msra.mxu0 %v4453_v39 }
 0x3d9   : > { %4039 = vmatprep.subr.bf16.mxu0 %v4157_v16 }
 0x3da   : > { %3838 = vmatmul.mubr.msk.f32.vlgmr.msra.gmra.mrb[24].mxu1 %vm1161_vm7, %v2406_v63 }
 0x3db   : > { %4035 = vmatpush3.bf16.msra.mxu1 %v4470_v47  ;;  %3859 = vmatprep.mubr.msk.f32.mxu1 %vm4156_vm1, %v4155_v13 }
 0x3dc   : > { %4036 = vmatprep.subr.bf16.mxu1 %v4157_v16 }
 0x3df   : > { %4038 = vmatpush3.bf16.msra.mxu1 %v4482_v54 }
 0x3e0   : > { %4045 = vmatprep.subr.bf16.mxu1 %v4157_v16 }
 0x4a5   : > { %v2476_v34 = vpop.f32.mrb[22].mxu1  ;;  %v2546_v37 = vpop.f32.mrb[22].mxu0 }
 0x4a6   : > { %v2477_v0 = vadd.f32 %v4536_v32, %v2476_v34  ;;  %v2547_v39 = vadd.f32 %v4546_v53, %v2546_v37  ;;  %v3817_v4 = vpop.f32.mrb[23].mxu1  ;;  %v3828_v5 = vpop.f32.mrb[23].mxu0 }
 0x4a8   : > { %v2621_v6 = vadd.f32 %v4531_v30, %v2477_v0  ;;  %v2629_v47 = vadd.f32 %v4533_v31, %v2547_v39 }
 0x4aa   : > { %v3456_v7 = vmul.f32 -1.442695, %v2621_v6  ;;  %v3457_v1 = vmul.f32 -1.442695, %v2629_v47  ;;  %v2903_v47 = vld [vmem:[%s4614_s26 + $0x40] sm:$0xff] }
 0x4ac   : > { %4121 = vpow2.f32 %v3456_v7  ;;  %v2904_v7 = vld [vmem:[%s4614_s26 + $0x48] sm:$0xff] }
 0x4ad   : > { %v2616_v8 = vpop.f32.mrb[24].mxu1  ;;  %4123 = vpow2.f32 %v3457_v1  ;;  %v2892_v1 = vpop.permute.xlu1 %2891 }
 0x4ae   : > { %v3839_v9 = vpop.f32.mrb[25].mxu1  ;;  %v2617_v12 = vadd.f32 %v4550_v2, %v2616_v8  ;;  %vm2893_vm12 = vcmp.eq.s32.totalorder %v2892_v1, 1 }
 0x4b6   : > { %v4122_v54 = vpop.eup %4121 }
 0x4b7   : > { %v2625_v41 = vadd.f32 1.0, %v4122_v54  ;;  %v4124_v10 = vpop.eup %4123 }
 0x4b8   : > { %v2633_v11 = vadd.f32 1.0, %v4124_v10  ;;  %v2906_v10 = vld [vmem:[%s4614_s26 + $0x58] sm:$0xff] }
 0x4b9   : > { %4125 = vrcp.f32 %v2625_v41  ;;  %v2905_v41 = vld [vmem:[%s4614_s26 + $0x50] sm:$0xff] }
 0x4ba   : > { %4127 = vrcp.f32 %v2633_v11 }
 0x4c3   : > { %v4126_v14 = vpop.eup %4125 }
 0x4c4   : > { %v2637_v18 = vmul.f32 %v4126_v14, %v2617_v12  ;;  %v4128_v31 = vpop.eup %4127 }
 0x4c5   : > { %v2640_v19 = vsub.f32 1.0, %v4128_v31  ;;  %v2642_v22 = vmul.f32 %v4128_v31, %v2406_v63 }
 0x4c6   : > { %v2638_v30 = vadd.f32 %v2637_v18, %v4543_v52  ;;  %v2895_v52 = vld [vmem:[%s4614_s26] sm:$0xff] }
 0x4c7   : > { %v4052_v33 = vpack.c.bf16 %v2896_v28, %v2895_v52 }
 0x4c8   : > { %4129 = vtanh.f32 %v2638_v30  ;;  %v718_v30 = vpop.permute.xlu1 %717 }
 0x4c9   : > { %vm719_vm13 = vcmp.eq.s32.totalorder %v4308_v29, %v718_v30 }
 0x4d2   : > { %v4130_v20 = vpop.eup %4129 }
 0x4d3   : > { %v2641_v21 = vmul.f32 %v4130_v20, %v2640_v19  ;;  %v3466_v19 = vld [vmem:[%s690_s30] ss:$0 sm:$0xff] }
 0x4d5   : > { %v2643_v24 = vadd.f32 %v2642_v22, %v2641_v21 }
 0x4d7   : > { %v4607_v27 = vsel %vm2649_vm11, %v2643_v24, %v2406_v63 }
 0x4d8   : > { %3849 = vmatmul.mubr.msk.f32.vlgmr.msra.gmra.mrb[24].mxu0 %vm1161_vm7, %v4607_v27  ;;  %3860 = vmatmul.mubr.msk.f32.vlgmr.msra.gmra.mrb[26].mxu1 %vm1161_vm7, %v4607_v27 }
 0x4d9   : > { %4041 = vmatpush3.bf16.msra.mxu0 %v4474_v50  ;;  %3870 = vmatprep.mubr.msk.f32.mxu0 %vm4156_vm1, %v4155_v13  ;;  %v2897_v50 = vld [vmem:[%s4614_s26 + $0x10] sm:$0xff] }
 0x4da   : > { %4042 = vmatprep.subr.bf16.mxu0 %v4157_v16  ;;  %3881 = vmatprep.mubr.msk.f32.mxu1 %vm4156_vm1, %v4155_v13  ;;  %v4055_v36 = vpack.c.bf16 %v2898_v35, %v2897_v50 }
 0x4dd   : > { %4044 = vmatpush3.bf16.msra.mxu0 %v4486_v55  ;;  %v2899_v55 = vld [vmem:[%s4614_s26 + $0x20] sm:$0xff] }
 0x4de   : > { %4051 = vmatprep.subr.bf16.mxu0 %v4157_v16  ;;  %v4046_v42 = vpack.c.bf16 %v2900_v38, %v2899_v55 }
 0x4e0   : > { %3871 = vmatmul.mubr.msk.f32.vlgmr.msra.gmra.mrb[26].mxu0 %vm1161_vm7, %v4607_v27  ;;  %4047 = vmatpush3.bf16.msra.mxu1 %v4046_v42 }
 0x4e1   : > { %4053 = vmatpush3.bf16.msra.mxu0 %v4052_v33  ;;  %3892 = vmatprep.mubr.msk.f32.mxu0 %vm4156_vm1, %v4155_v13 }
 0x4e2   : > { %4054 = vmatprep.subr.bf16.mxu0 %v4157_v16  ;;  %4048 = vmatprep.subr.bf16.mxu1 %v4157_v16 }
 0x4e4   : > { %4050 = vmatpush3.bf16.msra.mxu1 %v4049_v44 }
 0x4e5   : > { %4056 = vmatpush3.bf16.msra.mxu0 %v4055_v36  ;;  %4057 = vmatprep.subr.bf16.mxu1 %v4157_v16 }
 0x4e8   : > { %3893 = vmatmul.mubr.msk.f32.vlgmr.msra.gmra.mrb[28].mxu0 %vm1161_vm7, %v4399_v3 }
 0x5ab   : > { %v2720_v45 = vpop.f32.mrb[24].mxu0  ;;  %v2790_v46 = vpop.f32.mrb[26].mxu1 }
 0x5ac   : > { %v2721_v49 = vadd.f32 %v4536_v32, %v2720_v45  ;;  %v2791_v56 = vadd.f32 %v4546_v53, %v2790_v46  ;;  %v3850_v15 = vpop.f32.mrb[25].mxu0  ;;  %v3861_v3 = vpop.f32.mrb[27].mxu1 }
 0x5ae   : > { %v2865_v17 = vadd.f32 %v4527_v25, %v2721_v49  ;;  %v2873_v57 = vadd.f32 %v4529_v26, %v2791_v56 }
 0x5b0   : > { %v3461_v58 = vmul.f32 -1.442695, %v2865_v17  ;;  %v3462_v61 = vmul.f32 -1.442695, %v2873_v57 }
 0x5b2   : > { %4131 = vpow2.f32 %v3461_v58 }
 0x5b3   : > { %v2860_v59 = vpop.f32.mrb[26].mxu0  ;;  %4133 = vpow2.f32 %v3462_v61 }
 0x5b4   : > { %v3872_v60 = vpop.f32.mrb[27].mxu0  ;;  %v2861_v0 = vadd.f32 %v4550_v2, %v2860_v59  ;;  %v4058_v2 = vpack.c.bf16 %v2904_v7, %v2903_v47 }
 0x5bb   : > { %v3046_v62 = vpop.f32.mrb[28].mxu0 }
 0x5bc   : > { %v4132_v63 = vpop.eup %4131  ;;  %v3894_v34 = vpop.f32.mrb[29].mxu0 }
 0x5bd   : > { %v2869_v32 = vadd.f32 1.0, %v4132_v63  ;;  %v4134_v53 = vpop.eup %4133 }
 0x5be   : > { %v2877_v37 = vadd.f32 1.0, %v4134_v53 }
 0x5bf   : > { %4135 = vrcp.f32 %v2869_v32 }
 0x5c0   : > { %4137 = vrcp.f32 %v2877_v37 }
 0x5c9   : > { %v4136_v25 = vpop.eup %4135 }
 0x5ca   : > { %v2881_v26 = vmul.f32 %v4136_v25, %v2861_v0  ;;  %v4138_v4 = vpop.eup %4137 }
 0x5cb   : > { %v2884_v5 = vsub.f32 1.0, %v4138_v4  ;;  %v2886_v9 = vmul.f32 %v4138_v4, %v4607_v27 }
 0x5cc   : > { %v2882_v39 = vadd.f32 %v2881_v26, %v4541_v48  ;;  %v4061_v48 = vpack.c.bf16 %v2906_v10, %v2905_v41 }
 0x5ce   : > { %4139 = vtanh.f32 %v2882_v39 }
 0x5d8   : > { %v4140_v6 = vpop.eup %4139 }
 0x5d9   : > { %v2885_v8 = vmul.f32 %v4140_v6, %v2884_v5 }
 0x5db   : > { %v2887_v54 = vadd.f32 %v2886_v9, %v2885_v8 }
 0x5dd   : > { %v2894_v11 = vsel %vm2893_vm12, %v2887_v54, %v4607_v27 }
 0x5de   : > { %3882 = vmatmul.mubr.msk.f32.vlgmr.msra.gmra.mrb[28].mxu1 %vm1161_vm7, %v2894_v11 }
 0x5df   : > { %4059 = vmatpush3.bf16.msra.mxu1 %v4058_v2  ;;  %3903 = vmatprep.mubr.msk.f32.mxu1 %vm4156_vm1, %v4155_v13  ;;  %vm3154_vm1 = vcmask 0  }
 0x5e0   : > { %4060 = vmatprep.subr.bf16.mxu1 %v4157_v16 }
 0x5e3   : > { %4062 = vmatpush3.bf16.msra.mxu1 %v4061_v48 }
 0x5e6   : > { %3904 = vmatmul.mubr.msk.f32.vlgmr.msra.gmra.mrb[30].mxu1 %vm1161_vm7, %v4379_v51  ;;  %v720_v51 = vsel %vm719_vm13, 1.0, %v4155_v13 }
 0x6b1   : > { %v2976_v12 = vpop.f32.mrb[28].mxu1 }
 0x6b2   : > { %v3047_v14 = vadd.f32 %v3046_v62, %v2976_v12  ;;  %v3883_v18 = vpop.f32.mrb[29].mxu1 }
 0x6b9   : > { %v3116_v31 = vpop.f32.mrb[30].mxu1 }
 0x6ba   : > { %v3120_v20 = vadd.f32 %v3116_v31, %v3047_v14  ;;  %v3905_v21 = vpop.f32.mrb[31].mxu1 }
 0x6bc   : > { %v3128_v16 = vadd.f32 %v3466_v19, %v3120_v20 }
 0x6be   : > { %3129 = vst.msk [vmem:[%s694_s20] sm:$0xff] %vm721_vm4, %v3128_v16  ;;  %v3130_v22 = vsel %vm721_vm4, %v3128_v16, -inf  ;;  %v3142_v23 = vmul.f32 %v3128_v16, %v720_v51 }
 0x6bf   : > { %3131 = vmax.xlane.f32.xlu0 %v3130_v22 }
 0x6c0   : > { %v3143_v24 = vsel %vm721_vm4, %v3142_v23, 0.0 }
 0x6c3   : > { %3144 = vadd.xlane.f32.xlu0 %v3143_v24 }
 0x74c   : > { %v3132_v27 = vpop.xlane.xlu0 %3131 }
 0x74d   : > { %v3133_v29 = vsub.f32 %v3128_v16, %v3132_v27 }
 0x74f   : > { %v3134_v52 = vmul.f32 1.442695, %v3133_v29 }
 0x750   : > { %v3145_v55 = vpop.xlane.xlu0 %3144 }
 0x751   : > { %4141 = vpow2.f32 %v3134_v52 }
 0x75b   : > { %v4142_v28 = vpop.eup %4141 }
 0x75c   : > { %v3136_v33 = vsel %vm721_vm4, %v4142_v28, 0.0 }
 0x75d   : > { %3137 = vadd.xlane.f32.xlu1 %v3136_v33 }
 0x7ea   : > { %v3138_v50 = vpop.xlane.xlu1 %3137 }
 0x7eb   : > { %4143 = vlog2.f32 %v3138_v50 }
 0x7f5   : > { %v4144_v13 = vpop.eup %4143 }
 0x7f6   : > { %v3140_v35 = vmul.f32 0.6931472, %v4144_v13 }
 0x7f8   : > { %v3141_v36 = vadd.f32 %v3140_v35, %v3132_v27 }
 0x7fa   : > { %v3146_v38 = vsub.f32 %v3141_v36, %v3145_v55 }
 0x7fc   : > { %v3147_v40 = vrot.slane %v3146_v38, 4 }
 0x7fe   : > { %v3148_v42 = vadd.f32 %v3147_v40, %v3146_v38 }
 0x800   : > { %v3149_v43 = vrot.slane %v3148_v42, 2 }
 0x802   : > { %v3150_v44 = vadd.f32 %v3149_v43, %v3148_v42 }
 0x804   : > { %v3151_v45 = vrot.slane %v3150_v44, 1 }
 0x806   : > { %v3152_v46 = vadd.f32 %v3151_v45, %v3150_v44 }
 0x808   : > { %v3153_v49 = vmul.f32 0.125, %v3152_v46 }
 0x80a   : > { %3155 = vst.msk [vmem:[%s697_s22] sm:$0x1] %vm3154_vm1, %v3153_v49 }
 0x80b PF: > { %s26_s18 = sadd.s32 1, %s4151_s18  }
 0x80c   : > { %p23_p4 = scmp.ge.s32.totalorder %s26_s18, 4  }
 0x80e   :  { %25 = sbr.rel (!%p23_p4) target bundleno = 1 (0x1), region = 159 }

</bundles_post_ra>
